<compile_context>
chip_gen: v5e
topology: v5e:2x2
jax: 0.10.0
libtpu: 0.0.40
codegen_flags: <defaults>
</compile_context>

<pallas_src>
import functools

import jax
import jax.numpy as jnp
import numpy as np
from jax.experimental import pallas as pl
from jax.experimental.pallas import tpu as pltpu

BN_EPS = 1e-5


# ---------------------------------------------------------------------------
# Fused Pallas kernel: (residual GConv+BN) + (GConv+BN+ReLU) x2 + residual add
# All operands are pre-flattened / pre-folded in the wrapper; the kernel is
# three lane-dense 2D matmuls plus cheap affine/ReLU epilogues, all in VMEM.
# ---------------------------------------------------------------------------
def _fused_block_kernel(*refs, has_res_branch):
    if has_res_branch:
        (x_ref, m1_ref, s1_ref, t1_ref, m2_ref, s2_ref, t2_ref,
         mr_ref, sr_ref, tr_ref, o_ref) = refs
    else:
        (x_ref, m1_ref, s1_ref, t1_ref, m2_ref, s2_ref, t2_ref, o_ref) = refs

    x = x_ref[...]                                             # (bt, J*Cin)

    # Stage 1: gc1 + bn1 + relu   (bias+BN folded into scale/shift)
    h1 = jnp.dot(x, m1_ref[...], preferred_element_type=jnp.float32)
    h1 = jnp.maximum(h1 * s1_ref[...] + t1_ref[...], 0.0)

    # Stage 2: gc2 + bn2 + relu
    h2 = jnp.dot(h1, m2_ref[...], preferred_element_type=jnp.float32)
    h2 = jnp.maximum(h2 * s2_ref[...] + t2_ref[...], 0.0)

    # Residual branch
    if has_res_branch:
        res = (jnp.dot(x, mr_ref[...], preferred_element_type=jnp.float32)
               * sr_ref[...] + tr_ref[...])
    else:
        res = x                                                # nfeat == nout

    o_ref[...] = (h2 + res).astype(o_ref.dtype)                # (bt, J*nout)


# ---------------------------------------------------------------------------
# Wrapper-side folding (plain JAX, runs once per call; negligible cost)
# ---------------------------------------------------------------------------
def _fold_adj_weight(adj, w_grouped):
    """M[(k,i),(j,c)] = sum_g adj[g,j,k] * W[g,i,c]  (torch group broadcasting:
    the adjacency-group dim broadcasts against the weight-group dim)."""
    Ga, J, _ = adj.shape
    Gw, cin, cout = w_grouped.shape
    G = max(Ga, Gw)
    adj_b = jnp.broadcast_to(adj.astype(jnp.float32), (G, J, J))
    w_b = jnp.broadcast_to(w_grouped.astype(jnp.float32), (G, cin, cout))
    M = jnp.einsum('gjk,gic->kijc', adj_b, w_b)                # (J,Cin,J,Cout)
    return M.reshape(J * cin, J * cout)


def _fold_bias_bn(bias, gamma, beta, mean, var, J, cout):
    """Fold conv bias + BatchNorm1d(eval) into y*scale + shift (per column)."""
    scale = gamma * jax.lax.rsqrt(var + BN_EPS)                # (J*Cout,)
    shift = (jnp.tile(bias, (J,)) - mean) * scale + beta       # (J*Cout,)
    return scale.reshape(1, J * cout), shift.reshape(1, J * cout)


def _pick_batch_tile(B):
    for bt in (512, 256, 128, 64, 32, 16, 8):
        if B % bt == 0:
            return bt
    return B  # full-array block (always legal)


# ---------------------------------------------------------------------------
# Module forward
# ---------------------------------------------------------------------------
def gcn_residual_block_bn_new(x, adj, p, *, nfeat, nout):
    B, J, _ = x.shape
    has_res_branch = (nfeat != nout)

    x_flat = x.reshape(B, J * nfeat).astype(jnp.float32)

    M1 = _fold_adj_weight(adj, p['w1'])
    s1, t1 = _fold_bias_bn(p['b1'], p['bn1_gamma'], p['bn1_beta'],
                           p['bn1_mean'], p['bn1_var'], J, nout)
    M2 = _fold_adj_weight(adj, p['w2'])
    s2, t2 = _fold_bias_bn(p['b2'], p['bn2_gamma'], p['bn2_beta'],
                           p['bn2_mean'], p['bn2_var'], J, nout)

    args = [x_flat, M1, s1, t1, M2, s2, t2]

    def bcast(shape):
        return pl.BlockSpec(shape, lambda i: (0, 0))

    bt = _pick_batch_tile(B)
    grid = (B // bt,)

    in_specs = [pl.BlockSpec((bt, J * nfeat), lambda i: (i, 0)),
                bcast((J * nfeat, J * nout)),
                bcast((1, J * nout)), bcast((1, J * nout)),
                bcast((J * nout, J * nout)),
                bcast((1, J * nout)), bcast((1, J * nout))]

    if has_res_branch:
        Mr = _fold_adj_weight(adj, p['res_w'])
        sr, tr = _fold_bias_bn(p['res_b'], p['res_bn_gamma'], p['res_bn_beta'],
                               p['res_bn_mean'], p['res_bn_var'], J, nout)
        args += [Mr, sr, tr]
        in_specs += [bcast((J * nfeat, J * nout)),
                     bcast((1, J * nout)), bcast((1, J * nout))]

    kernel = functools.partial(_fused_block_kernel,
                               has_res_branch=has_res_branch)

    out_flat = pl.pallas_call(
        kernel,
        grid=grid,
        in_specs=in_specs,
        out_specs=pl.BlockSpec((bt, J * nout), lambda i: (i, 0)),
        out_shape=jax.ShapeDtypeStruct((B, J * nout), jnp.float32),
        compiler_params=pltpu.CompilerParams(
            dimension_semantics=("parallel",)),
    )(*args)

    return out_flat.reshape(B, J, nout)


# ---------------------------------------------------------------------------
# Pure-JAX reference (mirrors the PyTorch forward, eval mode)
# ---------------------------------------------------------------------------
def _gconv_ref(x, adj, w_grouped, bias):
    h = jnp.einsum('bji,gic->bjgc', x, w_grouped)        # (B, J, Gw, C)
    h = jnp.transpose(h, (0, 2, 1, 3))                   # (B, Gw, J, C)
    y = jnp.matmul(adj[None], h)                         # broadcast groups
    y = jnp.sum(y, axis=1) + bias
    return y


def _bn_ref(y, gamma, beta, mean, var):
    B, J, C = y.shape
    yf = y.reshape(B, J * C)
    yf = (yf - mean) / jnp.sqrt(var + BN_EPS) * gamma + beta
    return yf.reshape(B, J, C)


def _block_ref(x, adj, p, *, nfeat, nout):
    if nfeat == nout:
        residual = x
    else:
        residual = _bn_ref(_gconv_ref(x, adj, p['res_w'], p['res_b']),
                           p['res_bn_gamma'], p['res_bn_beta'],
                           p['res_bn_mean'], p['res_bn_var'])
    out = _bn_ref(_gconv_ref(x, adj, p['w1'], p['b1']),
                  p['bn1_gamma'], p['bn1_beta'], p['bn1_mean'], p['bn1_var'])
    out = jax.nn.relu(out)
    out = _bn_ref(_gconv_ref(out, adj, p['w2'], p['b2']),
                  p['bn2_gamma'], p['bn2_beta'], p['bn2_mean'], p['bn2_var'])
    out = jax.nn.relu(out)
    return out + residual


# ---------------------------------------------------------------------------
def _make_params(key, J, nfeat, nout, G):
    ks = jax.random.split(key, 16)

    def w_init(k, gw, cin, cout):
        bound = np.sqrt(6.0 / (cin + gw * cout))         # xavier_uniform-ish
        return jax.random.uniform(k, (gw, cin, cout), jnp.float32, -bound, bound)

    def b_init(k, cin, cout):
        bound = 1.0 / np.sqrt(cin)
        return jax.random.uniform(k, (cout,), jnp.float32, -bound, bound)

    def bn_init(k, n):
        k1, k2, k3, k4 = jax.random.split(k, 4)
        return dict(
            gamma=jax.random.uniform(k1, (n,), jnp.float32, 0.5, 1.5),
            beta=jax.random.normal(k2, (n,), jnp.float32) * 0.1,
            mean=jax.random.normal(k3, (n,), jnp.float32) * 0.1,
            var=jax.random.uniform(k4, (n,), jnp.float32, 0.5, 1.5),
        )

    bn1 = bn_init(ks[10], J * nout)
    bn2 = bn_init(ks[11], J * nout)
    p = dict(
        w1=w_init(ks[2], G, nfeat, nout), b1=b_init(ks[3], nfeat, nout),
        w2=w_init(ks[4], G, nout, nout),  b2=b_init(ks[5], nout, nout),
        bn1_gamma=bn1['gamma'], bn1_beta=bn1['beta'],
        bn1_mean=bn1['mean'], bn1_var=bn1['var'],
        bn2_gamma=bn2['gamma'], bn2_beta=bn2['beta'],
        bn2_mean=bn2['mean'], bn2_var=bn2['var'],
    )
    if nfeat != nout:
        bnr = bn_init(ks[12], J * nout)
        p.update(
            res_w=w_init(ks[6], 1, nfeat, nout),
            res_b=b_init(ks[7], nfeat, nout),
            res_bn_gamma=bnr['gamma'], res_bn_beta=bnr['beta'],
            res_bn_mean=bnr['mean'], res_bn_var=bnr['var'],
        )
    return p


if __name__ == "__main__":
    B, J = 8, 16            # batch, num_joints
    G = 2                   # num_groups for gc1/gc2 (residual_gc uses 1 group)

    key = jax.random.PRNGKey(0)
    k_x, k_adj, k_p1, k_p2 = jax.random.split(key, 4)

    adj = jax.random.normal(k_adj, (G, J, J), jnp.float32) * 0.2

    # --- case 1: nfeat != nout -> 'diff' residual branch (residual_gc + bn) ---
    nfeat, nout = 16, 32
    x = jax.random.normal(k_x, (B, J, nfeat), jnp.float32)
    params = _make_params(k_p1, J, nfeat, nout, G)

    out = gcn_residual_block_bn_new(x, adj, params, nfeat=nfeat, nout=nout)
    out = jax.block_until_ready(out)
    ref = _block_ref(x, adj, params, nfeat=nfeat, nout=nout)
    np.testing.assert_allclose(np.asarray(out), np.asarray(ref),
                               rtol=2e-4, atol=2e-4)

    # --- case 2: nfeat == nout -> 'same' (identity) residual ---
    nfeat2 = nout2 = 32
    x2 = jax.random.normal(k_x, (B, J, nfeat2), jnp.float32)
    params2 = _make_params(k_p2, J, nfeat2, nout2, G)

    out2 = gcn_residual_block_bn_new(x2, adj, params2, nfeat=nfeat2, nout=nout2)
    out2 = jax.block_until_ready(out2)
    ref2 = _block_ref(x2, adj, params2, nfeat=nfeat2, nout=nout2)
    np.testing.assert_allclose(np.asarray(out2), np.asarray(ref2),
                               rtol=2e-4, atol=2e-4)

    print("KERNEL_OK")
</pallas_src>

<mosaic_0001>
module attributes {stable_mosaic.version = 11 : i64} {
  func.func @_fused_block_kernel(%arg0: i32, %arg1: memref<8x256xf32, #tpu.memory_space<vmem>>, %arg2: memref<256x512xf32, #tpu.memory_space<vmem>>, %arg3: memref<1x512xf32, #tpu.memory_space<vmem>>, %arg4: memref<1x512xf32, #tpu.memory_space<vmem>>, %arg5: memref<512x512xf32, #tpu.memory_space<vmem>>, %arg6: memref<1x512xf32, #tpu.memory_space<vmem>>, %arg7: memref<1x512xf32, #tpu.memory_space<vmem>>, %arg8: memref<256x512xf32, #tpu.memory_space<vmem>>, %arg9: memref<1x512xf32, #tpu.memory_space<vmem>>, %arg10: memref<1x512xf32, #tpu.memory_space<vmem>>, %arg11: memref<8x512xf32, #tpu.memory_space<vmem>>) attributes {dimension_semantics = [#tpu.dimension_semantics<parallel>], iteration_bounds = array<i64: 1>, scalar_prefetch = 0 : i64, scratch_operands = 0 : i64, tpu.core_type = #tpu.core_type<tc>, window_params = [{transform_indices = @transform_0, window_bounds = array<i64: 8, 256>}, {pipeline_mode = #tpu.pipeline_mode<synchronous>, transform_indices = @transform_1, window_bounds = array<i64: 256, 512>}, {pipeline_mode = #tpu.pipeline_mode<synchronous>, transform_indices = @transform_2, window_bounds = array<i64: 1, 512>}, {pipeline_mode = #tpu.pipeline_mode<synchronous>, transform_indices = @transform_3, window_bounds = array<i64: 1, 512>}, {pipeline_mode = #tpu.pipeline_mode<synchronous>, transform_indices = @transform_4, window_bounds = array<i64: 512, 512>}, {pipeline_mode = #tpu.pipeline_mode<synchronous>, transform_indices = @transform_5, window_bounds = array<i64: 1, 512>}, {pipeline_mode = #tpu.pipeline_mode<synchronous>, transform_indices = @transform_6, window_bounds = array<i64: 1, 512>}, {pipeline_mode = #tpu.pipeline_mode<synchronous>, transform_indices = @transform_7, window_bounds = array<i64: 256, 512>}, {pipeline_mode = #tpu.pipeline_mode<synchronous>, transform_indices = @transform_8, window_bounds = array<i64: 1, 512>}, {pipeline_mode = #tpu.pipeline_mode<synchronous>, transform_indices = @transform_9, window_bounds = array<i64: 1, 512>}, {transform_indices = @transform_10, window_bounds = array<i64: 8, 512>}]} {
    %c0 = arith.constant 0 : index
    %c0_0 = arith.constant 0 : index
    %0 = vector.load %arg1[%c0, %c0_0] : memref<8x256xf32, #tpu.memory_space<vmem>>, vector<8x256xf32>
    %c0_1 = arith.constant 0 : index
    %c0_2 = arith.constant 0 : index
    %1 = vector.load %arg2[%c0_1, %c0_2] : memref<256x512xf32, #tpu.memory_space<vmem>>, vector<256x512xf32>
    %cst = arith.constant dense<0.000000e+00> : vector<8x512xf32>
    %2 = tpu.matmul %0, %1, %cst {dimension_numbers = #tpu.dot_dimension_numbers<[1], [0], [0], [1], [0, 0, 1, 1], [], []>} : vector<8x256xf32>, vector<256x512xf32>, vector<8x512xf32> -> vector<8x512xf32>
    %c0_3 = arith.constant 0 : index
    %c0_4 = arith.constant 0 : index
    %3 = vector.load %arg3[%c0_3, %c0_4] : memref<1x512xf32, #tpu.memory_space<vmem>>, vector<1x512xf32>
    %4 = vector.broadcast %3 : vector<1x512xf32> to vector<8x512xf32>
    %5 = arith.mulf %2, %4 : vector<8x512xf32>
    %c0_5 = arith.constant 0 : index
    %c0_6 = arith.constant 0 : index
    %6 = vector.load %arg4[%c0_5, %c0_6] : memref<1x512xf32, #tpu.memory_space<vmem>>, vector<1x512xf32>
    %7 = vector.broadcast %6 : vector<1x512xf32> to vector<8x512xf32>
    %8 = arith.addf %5, %7 : vector<8x512xf32>
    %cst_7 = arith.constant 0.000000e+00 : f32
    %9 = vector.broadcast %cst_7 : f32 to vector<8x512xf32>
    %10 = arith.maximumf %8, %9 : vector<8x512xf32>
    %c0_8 = arith.constant 0 : index
    %c0_9 = arith.constant 0 : index
    %11 = vector.load %arg5[%c0_8, %c0_9] : memref<512x512xf32, #tpu.memory_space<vmem>>, vector<512x512xf32>
    %cst_10 = arith.constant dense<0.000000e+00> : vector<8x512xf32>
    %12 = tpu.matmul %10, %11, %cst_10 {dimension_numbers = #tpu.dot_dimension_numbers<[1], [0], [0], [1], [0, 0, 1, 1], [], []>} : vector<8x512xf32>, vector<512x512xf32>, vector<8x512xf32> -> vector<8x512xf32>
    %c0_11 = arith.constant 0 : index
    %c0_12 = arith.constant 0 : index
    %13 = vector.load %arg6[%c0_11, %c0_12] : memref<1x512xf32, #tpu.memory_space<vmem>>, vector<1x512xf32>
    %14 = vector.broadcast %13 : vector<1x512xf32> to vector<8x512xf32>
    %15 = arith.mulf %12, %14 : vector<8x512xf32>
    %c0_13 = arith.constant 0 : index
    %c0_14 = arith.constant 0 : index
    %16 = vector.load %arg7[%c0_13, %c0_14] : memref<1x512xf32, #tpu.memory_space<vmem>>, vector<1x512xf32>
    %17 = vector.broadcast %16 : vector<1x512xf32> to vector<8x512xf32>
    %18 = arith.addf %15, %17 : vector<8x512xf32>
    %cst_15 = arith.constant 0.000000e+00 : f32
    %19 = vector.broadcast %cst_15 : f32 to vector<8x512xf32>
    %20 = arith.maximumf %18, %19 : vector<8x512xf32>
    %c0_16 = arith.constant 0 : index
    %c0_17 = arith.constant 0 : index
    %21 = vector.load %arg8[%c0_16, %c0_17] : memref<256x512xf32, #tpu.memory_space<vmem>>, vector<256x512xf32>
    %cst_18 = arith.constant dense<0.000000e+00> : vector<8x512xf32>
    %22 = tpu.matmul %0, %21, %cst_18 {dimension_numbers = #tpu.dot_dimension_numbers<[1], [0], [0], [1], [0, 0, 1, 1], [], []>} : vector<8x256xf32>, vector<256x512xf32>, vector<8x512xf32> -> vector<8x512xf32>
    %c0_19 = arith.constant 0 : index
    %c0_20 = arith.constant 0 : index
    %23 = vector.load %arg9[%c0_19, %c0_20] : memref<1x512xf32, #tpu.memory_space<vmem>>, vector<1x512xf32>
    %24 = vector.broadcast %23 : vector<1x512xf32> to vector<8x512xf32>
    %25 = arith.mulf %22, %24 : vector<8x512xf32>
    %c0_21 = arith.constant 0 : index
    %c0_22 = arith.constant 0 : index
    %26 = vector.load %arg10[%c0_21, %c0_22] : memref<1x512xf32, #tpu.memory_space<vmem>>, vector<1x512xf32>
    %27 = vector.broadcast %26 : vector<1x512xf32> to vector<8x512xf32>
    %28 = arith.addf %25, %27 : vector<8x512xf32>
    %29 = arith.addf %20, %28 : vector<8x512xf32>
    %c0_23 = arith.constant 0 : index
    %c0_24 = arith.constant 0 : index
    %30 = vector.load %arg11[%c0_23, %c0_24] : memref<8x512xf32, #tpu.memory_space<vmem>>, vector<8x512xf32>
    tpu.vector_store %arg11[%c0_23, %c0_24], %29 {strides = array<i32>} : memref<8x512xf32, #tpu.memory_space<vmem>>, vector<8x512xf32>,
    return
  }
  func.func @transform_0(%arg0: i32) -> (i32, i32) {
    %c0_i32 = arith.constant 0 : i32
    %c0_i32_0 = arith.constant 0 : i32
    return %arg0, %c0_i32 : i32, i32
  }
  func.func @transform_1(%arg0: i32) -> (i32, i32) {
    %c0_i32 = arith.constant 0 : i32
    %c0_i32_0 = arith.constant 0 : i32
    %c0_i32_1 = arith.constant 0 : i32
    return %c0_i32, %c0_i32_0 : i32, i32
  }
  func.func @transform_2(%arg0: i32) -> (i32, i32) {
    %c0_i32 = arith.constant 0 : i32
    %c0_i32_0 = arith.constant 0 : i32
    %c0_i32_1 = arith.constant 0 : i32
    return %c0_i32, %c0_i32_0 : i32, i32
  }
  func.func @transform_3(%arg0: i32) -> (i32, i32) {
    %c0_i32 = arith.constant 0 : i32
    %c0_i32_0 = arith.constant 0 : i32
    %c0_i32_1 = arith.constant 0 : i32
    return %c0_i32, %c0_i32_0 : i32, i32
  }
  func.func @transform_4(%arg0: i32) -> (i32, i32) {
    %c0_i32 = arith.constant 0 : i32
    %c0_i32_0 = arith.constant 0 : i32
    %c0_i32_1 = arith.constant 0 : i32
    return %c0_i32, %c0_i32_0 : i32, i32
  }
  func.func @transform_5(%arg0: i32) -> (i32, i32) {
    %c0_i32 = arith.constant 0 : i32
    %c0_i32_0 = arith.constant 0 : i32
    %c0_i32_1 = arith.constant 0 : i32
    return %c0_i32, %c0_i32_0 : i32, i32
  }
  func.func @transform_6(%arg0: i32) -> (i32, i32) {
    %c0_i32 = arith.constant 0 : i32
    %c0_i32_0 = arith.constant 0 : i32
    %c0_i32_1 = arith.constant 0 : i32
    return %c0_i32, %c0_i32_0 : i32, i32
  }
  func.func @transform_7(%arg0: i32) -> (i32, i32) {
    %c0_i32 = arith.constant 0 : i32
    %c0_i32_0 = arith.constant 0 : i32
    %c0_i32_1 = arith.constant 0 : i32
    return %c0_i32, %c0_i32_0 : i32, i32
  }
  func.func @transform_8(%arg0: i32) -> (i32, i32) {
    %c0_i32 = arith.constant 0 : i32
    %c0_i32_0 = arith.constant 0 : i32
    %c0_i32_1 = arith.constant 0 : i32
    return %c0_i32, %c0_i32_0 : i32, i32
  }
  func.func @transform_9(%arg0: i32) -> (i32, i32) {
    %c0_i32 = arith.constant 0 : i32
    %c0_i32_0 = arith.constant 0 : i32
    %c0_i32_1 = arith.constant 0 : i32
    return %c0_i32, %c0_i32_0 : i32, i32
  }
  func.func @transform_10(%arg0: i32) -> (i32, i32) {
    %c0_i32 = arith.constant 0 : i32
    %c0_i32_0 = arith.constant 0 : i32
    return %arg0, %c0_i32 : i32, i32
  }
}

</mosaic_0001>

<bundles_post_ra>
// kernel: tpu_custom_call.1
= control target key start
LH: loop header
LB: loop body
LE: loop exit
PB: predicated region body
PF: predicated region fallthrough
CT: control target
= control target key end

     0   :  { %15 = vsyncpa [#allocation3], 0  ;;  %s1862_s0 = inlined_call_operand.hbm [shape: f32[8,256], index: 0, kind: input, shape index: {}]   ;;  %s1863_s1 = inlined_call_operand.hbm [shape: f32[256,512], index: 1, kind: input, shape index: {}]   ;;  %s1864_s2 = inlined_call_operand.hbm [shape: f32[1,512], index: 2, kind: input, shape index: {}]   ;;  %s1865_s3 = inlined_call_operand.hbm [shape: f32[1,512], index: 3, kind: input, shape index: {}]   ;;  %s1866_s4 = inlined_call_operand.hbm [shape: f32[512,512], index: 4, kind: input, shape index: {}]   ;;  %s1867_s5 = inlined_call_operand.vmem [shape: f32[1,512], index: 5, kind: input, shape index: {}]   ;;  %s1868_s6 = inlined_call_operand.hbm [shape: f32[1,512], index: 6, kind: input, shape index: {}]   ;;  %s1869_s7 = inlined_call_operand.hbm [shape: f32[256,512], index: 7, kind: input, shape index: {}]   ;;  %s1870_s8 = inlined_call_operand.hbm [shape: f32[1,512], index: 8, kind: input, shape index: {}]   ;;  %s1871_s9 = inlined_call_operand.vmem [shape: f32[1,512], index: 9, kind: input, shape index: {}]   ;;  %s1872_s10 = inlined_call_operand.hbm [shape: f32[8,512], index: 10, kind: output, shape index: {}]  }
   0x1   :  { %16 = vsyncpa [#allocation6], 0 }
   0x2   :  { %17 = vsyncpa [#allocation9], 0 }
   0x3   :  { %18 = vsyncpa [#allocation12], 0 }
   0x4   :  { %19 = vsyncpa [#allocation15], 0  ;;  %s36_s15 = sshll.u32 %s1863_s1, 4  ;;  %s37_s15 = int_to_ptr.hbm [resolvable:$true] %s36_s15 }
   0x5   :  { %20 = vsyncpa [#allocation4], 0  ;;  %s1667_s16 = smov [#allocation5]   ;;  %s61_s20 = sshll.u32 %s1865_s3, 4  ;;  %s62_s20 = int_to_ptr.hbm [resolvable:$true] %s61_s20 }
   0x6   :  { %s38_s17 = sshll.u32 %s1667_s16, 4  ;;  %s1668_s21 = smov 512   ;;  %s39_s17 = int_to_ptr.vmem [resolvable:$true] %s38_s17 }
   0x7   :  { %s1669_s22 = smov 32   ;;  %s1670_s23 = smov [#allocation8]  }
   0x8   :  { %44 = dma.hbm_to_vmem [thread:$0]  %s37_s15, 16384, %s39_s17, [#allocation6], %s1668_s21, %s1668_s21, %s1669_s22  }
   0x9   :  { %s63_s24 = sshll.u32 %s1670_s23, 4  ;;  %s87_s26 = sshll.u32 %s1868_s6, 4  ;;  %s64_s24 = int_to_ptr.vmem [resolvable:$true] %s63_s24  ;;  %s88_s26 = int_to_ptr.hbm [resolvable:$true] %s87_s26 }
   0xa   :  { %66 = dma.hbm_to_vmem [thread:$0]  %s62_s20, 64, %s64_s24, [#allocation9]  }
   0xb   :  { %s26_s3 = sshll.u32 %s1862_s0, 4  ;;  %s1671_s29 = smov [#allocation11]   ;;  %s27_s3 = int_to_ptr.hbm [resolvable:$true] %s26_s3 }
   0xc   :  { %s89_s30 = sshll.u32 %s1671_s29, 4  ;;  %s1672_s11 = smov [#allocation2]   ;;  %s90_s30 = int_to_ptr.vmem [resolvable:$true] %s89_s30 }
   0xd   :  { %92 = dma.hbm_to_vmem [thread:$0]  %s88_s26, 64, %s90_s30, [#allocation12]  }
   0xe   :  { %s28_s12 = sshll.u32 %s1672_s11, 4  ;;  %s50_s15 = sshll.u32 %s1864_s2, 4  ;;  %s29_s12 = int_to_ptr.vmem [resolvable:$true] %s28_s12  ;;  %s51_s15 = int_to_ptr.hbm [resolvable:$true] %s50_s15 }
   0xf   :  { %31 = dma.hbm_to_vmem [thread:$0]  %s27_s3, 256, %s29_s12, [#allocation3]  }
  0x10   :  { %s71_s17 = sshll.u32 %s1866_s4, 4  ;;  %s1673_s18 = smov [#allocation7]   ;;  %s72_s17 = int_to_ptr.hbm [resolvable:$true] %s71_s17 }
  0x11   :  { %s52_s0 = sshll.u32 %s1673_s18, 4  ;;  %s1674_s19 = smov [#allocation10]   ;;  %s53_s0 = int_to_ptr.vmem [resolvable:$true] %s52_s0 }
  0x12   :  { %55 = dma.hbm_to_vmem [thread:$0]  %s51_s15, 64, %s53_s0, [#allocation6]  }
  0x13   :  { %s73_s20 = sshll.u32 %s1674_s19, 4  ;;  %s97_s25 = sshll.u32 %s1869_s7, 4  ;;  %s74_s20 = int_to_ptr.vmem [resolvable:$true] %s73_s20  ;;  %s98_s25 = int_to_ptr.hbm [resolvable:$true] %s97_s25 }
  0x14   :  { %79 = dma.hbm_to_vmem [thread:$0]  %s72_s17, 32768, %s74_s20, [#allocation9], %s1668_s21, %s1668_s21, %s1669_s22  }
  0x15   :  { %s111_s4 = sshll.u32 %s1870_s8, 4  ;;  %s1675_s26 = smov [#allocation13]   ;;  %s112_s4 = int_to_ptr.hbm [resolvable:$true] %s111_s4 }
  0x16   :  { %s99_s27 = sshll.u32 %s1675_s26, 4  ;;  %s1676_s28 = smov [#allocation14]   ;;  %s100_s27 = int_to_ptr.vmem [resolvable:$true] %s99_s27 }
  0x17   :  { %105 = dma.hbm_to_vmem [thread:$0]  %s98_s25, 16384, %s100_s27, [#allocation12], %s1668_s21, %s1668_s21, %s1669_s22  }
  0x18   :  { %s113_s7 = sshll.u32 %s1676_s28, 4  ;;  %s114_s7 = int_to_ptr.vmem [resolvable:$true] %s113_s7 }
  0x19   :  { %116 = dma.hbm_to_vmem [thread:$0]  %s112_s4, 64, %s114_s7, [#allocation15]  }
  0x1a   :  { %1655 = dma.done.wait [#allocation3], 256  }
  0x1b   :  { %1656 = vsyncadd [#allocation3], 4294967040 }
  0x1c   :  { %1657 = dma.done.wait [#allocation6], 16448  }
  0x1d   :  { %1658 = vsyncadd [#allocation6], 4294950848 }
  0x1e   :  { %1659 = dma.done.wait [#allocation9], 32832  }
  0x1f   :  { %1660 = vsyncadd [#allocation9], 4294934464 }
  0x20   :  { %1661 = dma.done.wait [#allocation12], 16448  }
  0x21   :  { %1662 = vsyncadd [#allocation12], 4294950848 }
  0x22   :  { %1663 = dma.done.wait [#allocation15], 64  }
  0x23   :  { %1664 = vsyncadd [#allocation15], 4294967232  ;;  %v213_v0 = vld [vmem:[#allocation5 + $0x1e0] sm:$0xff]  ;;  %v214_v2 = vld [vmem:[#allocation5 + $0x1e8] sm:$0xff]  ;;  %s1412_s11 = sshll.u32 %s1872_s10, 4  ;;  %s1413_s11 = int_to_ptr.hbm [resolvable:$true] %s1412_s11 }
  0x24   :  { %v277_v1 = vld [vmem:[#allocation5 + $0x3e0] sm:$0xff]  ;;  %281 = vmatpush.msra.mxu0 %v213_v0  ;;  %v278_v3 = vld [vmem:[#allocation5 + $0x3e8] sm:$0xff]  ;;  %321 = vmatpush.msra.mxu2 %v214_v2  ;;  %v1766_v0 = vld [vmem:[#allocation2] sm:$0xff] }
  0x25   :  { %301 = vmatpush.msra.mxu1 %v277_v1  ;;  %v209_v4 = vld [vmem:[#allocation5 + $0x1c0] sm:$0xff]  ;;  %341 = vmatpush.msra.mxu3 %v278_v3  ;;  %v210_v6 = vld [vmem:[#allocation5 + $0x1c8] sm:$0xff]  ;;  %v1768_v1 = vld [vmem:[#allocation2 + $0x8] sm:$0xff] }
  0x26   :  { %v273_v5 = vld [vmem:[#allocation5 + $0x3c0] sm:$0xff]  ;;  %v274_v7 = vld [vmem:[#allocation5 + $0x3c8] sm:$0xff]  ;;  %282 = vmatpush.msra.mxu0 %v209_v4  ;;  %322 = vmatpush.msra.mxu2 %v210_v6  ;;  %v215_v2 = vld [vmem:[#allocation5 + $0x1f0] sm:$0xff] }
  0x27   :  { %v205_v8 = vld [vmem:[#allocation5 + $0x1a0] sm:$0xff]  ;;  %302 = vmatpush.msra.mxu1 %v273_v5  ;;  %v206_v10 = vld [vmem:[#allocation5 + $0x1a8] sm:$0xff]  ;;  %342 = vmatpush.msra.mxu3 %v274_v7  ;;  %v279_v3 = vld [vmem:[#allocation5 + $0x3f0] sm:$0xff] }
  0x28   :  { %v269_v9 = vld [vmem:[#allocation5 + $0x3a0] sm:$0xff]  ;;  %v270_v11 = vld [vmem:[#allocation5 + $0x3a8] sm:$0xff]  ;;  %283 = vmatpush.msra.mxu0 %v205_v8  ;;  %323 = vmatpush.msra.mxu2 %v206_v10  ;;  %v216_v4 = vld [vmem:[#allocation5 + $0x1f8] sm:$0xff] }
  0x29   :  { %v201_v12 = vld [vmem:[#allocation5 + $0x180] sm:$0xff]  ;;  %303 = vmatpush.msra.mxu1 %v269_v9  ;;  %v202_v14 = vld [vmem:[#allocation5 + $0x188] sm:$0xff]  ;;  %343 = vmatpush.msra.mxu3 %v270_v11  ;;  %v280_v5 = vld [vmem:[#allocation5 + $0x3f8] sm:$0xff] }
  0x2a   :  { %v265_v13 = vld [vmem:[#allocation5 + $0x380] sm:$0xff]  ;;  %v266_v15 = vld [vmem:[#allocation5 + $0x388] sm:$0xff]  ;;  %284 = vmatpush.msra.mxu0 %v201_v12  ;;  %324 = vmatpush.msra.mxu2 %v202_v14  ;;  %v211_v6 = vld [vmem:[#allocation5 + $0x1d0] sm:$0xff] }
  0x2b   :  { %v197_v16 = vld [vmem:[#allocation5 + $0x160] sm:$0xff]  ;;  %304 = vmatpush.msra.mxu1 %v265_v13  ;;  %v198_v18 = vld [vmem:[#allocation5 + $0x168] sm:$0xff]  ;;  %344 = vmatpush.msra.mxu3 %v266_v15  ;;  %v275_v7 = vld [vmem:[#allocation5 + $0x3d0] sm:$0xff] }
  0x2c   :  { %v261_v17 = vld [vmem:[#allocation5 + $0x360] sm:$0xff]  ;;  %v262_v19 = vld [vmem:[#allocation5 + $0x368] sm:$0xff]  ;;  %285 = vmatpush.msra.mxu0 %v197_v16  ;;  %325 = vmatpush.msra.mxu2 %v198_v18  ;;  %v212_v8 = vld [vmem:[#allocation5 + $0x1d8] sm:$0xff] }
  0x2d   :  { %v193_v20 = vld [vmem:[#allocation5 + $0x140] sm:$0xff]  ;;  %305 = vmatpush.msra.mxu1 %v261_v17  ;;  %v194_v22 = vld [vmem:[#allocation5 + $0x148] sm:$0xff]  ;;  %345 = vmatpush.msra.mxu3 %v262_v19  ;;  %v276_v9 = vld [vmem:[#allocation5 + $0x3d8] sm:$0xff] }
  0x2e   :  { %v257_v21 = vld [vmem:[#allocation5 + $0x340] sm:$0xff]  ;;  %v258_v23 = vld [vmem:[#allocation5 + $0x348] sm:$0xff]  ;;  %286 = vmatpush.msra.mxu0 %v193_v20  ;;  %326 = vmatpush.msra.mxu2 %v194_v22  ;;  %v207_v10 = vld [vmem:[#allocation5 + $0x1b0] sm:$0xff] }
  0x2f   :  { %v189_v24 = vld [vmem:[#allocation5 + $0x120] sm:$0xff]  ;;  %306 = vmatpush.msra.mxu1 %v257_v21  ;;  %v190_v26 = vld [vmem:[#allocation5 + $0x128] sm:$0xff]  ;;  %346 = vmatpush.msra.mxu3 %v258_v23  ;;  %v271_v11 = vld [vmem:[#allocation5 + $0x3b0] sm:$0xff] }
  0x30   :  { %v253_v25 = vld [vmem:[#allocation5 + $0x320] sm:$0xff]  ;;  %v254_v27 = vld [vmem:[#allocation5 + $0x328] sm:$0xff]  ;;  %287 = vmatpush.msra.mxu0 %v189_v24  ;;  %327 = vmatpush.msra.mxu2 %v190_v26  ;;  %v208_v12 = vld [vmem:[#allocation5 + $0x1b8] sm:$0xff] }
  0x31   :  { %v185_v28 = vld [vmem:[#allocation5 + $0x100] sm:$0xff]  ;;  %307 = vmatpush.msra.mxu1 %v253_v25  ;;  %v186_v30 = vld [vmem:[#allocation5 + $0x108] sm:$0xff]  ;;  %347 = vmatpush.msra.mxu3 %v254_v27  ;;  %v272_v13 = vld [vmem:[#allocation5 + $0x3b8] sm:$0xff] }
  0x32   :  { %v249_v29 = vld [vmem:[#allocation5 + $0x300] sm:$0xff]  ;;  %v250_v31 = vld [vmem:[#allocation5 + $0x308] sm:$0xff]  ;;  %288 = vmatpush.msra.mxu0 %v185_v28  ;;  %328 = vmatpush.msra.mxu2 %v186_v30  ;;  %v203_v14 = vld [vmem:[#allocation5 + $0x190] sm:$0xff] }
  0x33   :  { %v181_v32 = vld [vmem:[#allocation5 + $0xe0] sm:$0xff]  ;;  %308 = vmatpush.msra.mxu1 %v249_v29  ;;  %v182_v34 = vld [vmem:[#allocation5 + $0xe8] sm:$0xff]  ;;  %348 = vmatpush.msra.mxu3 %v250_v31  ;;  %v267_v15 = vld [vmem:[#allocation5 + $0x390] sm:$0xff] }
  0x34   :  { %v245_v33 = vld [vmem:[#allocation5 + $0x2e0] sm:$0xff]  ;;  %v246_v35 = vld [vmem:[#allocation5 + $0x2e8] sm:$0xff]  ;;  %289 = vmatpush.msra.mxu0 %v181_v32  ;;  %329 = vmatpush.msra.mxu2 %v182_v34  ;;  %v204_v16 = vld [vmem:[#allocation5 + $0x198] sm:$0xff] }
  0x35   :  { %v177_v36 = vld [vmem:[#allocation5 + $0xc0] sm:$0xff]  ;;  %309 = vmatpush.msra.mxu1 %v245_v33  ;;  %v178_v38 = vld [vmem:[#allocation5 + $0xc8] sm:$0xff]  ;;  %349 = vmatpush.msra.mxu3 %v246_v35  ;;  %v268_v17 = vld [vmem:[#allocation5 + $0x398] sm:$0xff] }
  0x36   :  { %v241_v37 = vld [vmem:[#allocation5 + $0x2c0] sm:$0xff]  ;;  %v242_v39 = vld [vmem:[#allocation5 + $0x2c8] sm:$0xff]  ;;  %290 = vmatpush.msra.mxu0 %v177_v36  ;;  %330 = vmatpush.msra.mxu2 %v178_v38  ;;  %v199_v18 = vld [vmem:[#allocation5 + $0x170] sm:$0xff] }
  0x37   :  { %v173_v40 = vld [vmem:[#allocation5 + $0xa0] sm:$0xff]  ;;  %310 = vmatpush.msra.mxu1 %v241_v37  ;;  %v174_v42 = vld [vmem:[#allocation5 + $0xa8] sm:$0xff]  ;;  %350 = vmatpush.msra.mxu3 %v242_v39  ;;  %v263_v19 = vld [vmem:[#allocation5 + $0x370] sm:$0xff] }
  0x38   :  { %v237_v41 = vld [vmem:[#allocation5 + $0x2a0] sm:$0xff]  ;;  %v238_v43 = vld [vmem:[#allocation5 + $0x2a8] sm:$0xff]  ;;  %291 = vmatpush.msra.mxu0 %v173_v40  ;;  %331 = vmatpush.msra.mxu2 %v174_v42  ;;  %v200_v20 = vld [vmem:[#allocation5 + $0x178] sm:$0xff] }
  0x39   :  { %v169_v44 = vld [vmem:[#allocation5 + $0x80] sm:$0xff]  ;;  %311 = vmatpush.msra.mxu1 %v237_v41  ;;  %v170_v46 = vld [vmem:[#allocation5 + $0x88] sm:$0xff]  ;;  %351 = vmatpush.msra.mxu3 %v238_v43  ;;  %v264_v21 = vld [vmem:[#allocation5 + $0x378] sm:$0xff] }
  0x3a   :  { %v233_v45 = vld [vmem:[#allocation5 + $0x280] sm:$0xff]  ;;  %v234_v47 = vld [vmem:[#allocation5 + $0x288] sm:$0xff]  ;;  %292 = vmatpush.msra.mxu0 %v169_v44  ;;  %332 = vmatpush.msra.mxu2 %v170_v46  ;;  %v195_v22 = vld [vmem:[#allocation5 + $0x150] sm:$0xff] }
  0x3b   :  { %v165_v48 = vld [vmem:[#allocation5 + $0x60] sm:$0xff]  ;;  %312 = vmatpush.msra.mxu1 %v233_v45  ;;  %v166_v50 = vld [vmem:[#allocation5 + $0x68] sm:$0xff]  ;;  %352 = vmatpush.msra.mxu3 %v234_v47  ;;  %v259_v23 = vld [vmem:[#allocation5 + $0x350] sm:$0xff] }
  0x3c   :  { %v229_v49 = vld [vmem:[#allocation5 + $0x260] sm:$0xff]  ;;  %v230_v51 = vld [vmem:[#allocation5 + $0x268] sm:$0xff]  ;;  %293 = vmatpush.msra.mxu0 %v165_v48  ;;  %333 = vmatpush.msra.mxu2 %v166_v50  ;;  %v196_v24 = vld [vmem:[#allocation5 + $0x158] sm:$0xff] }
  0x3d   :  { %v161_v52 = vld [vmem:[#allocation5 + $0x40] sm:$0xff]  ;;  %313 = vmatpush.msra.mxu1 %v229_v49  ;;  %v162_v54 = vld [vmem:[#allocation5 + $0x48] sm:$0xff]  ;;  %353 = vmatpush.msra.mxu3 %v230_v51  ;;  %v260_v25 = vld [vmem:[#allocation5 + $0x358] sm:$0xff] }
  0x3e   :  { %v225_v53 = vld [vmem:[#allocation5 + $0x240] sm:$0xff]  ;;  %v226_v55 = vld [vmem:[#allocation5 + $0x248] sm:$0xff]  ;;  %294 = vmatpush.msra.mxu0 %v161_v52  ;;  %334 = vmatpush.msra.mxu2 %v162_v54  ;;  %v191_v26 = vld [vmem:[#allocation5 + $0x130] sm:$0xff] }
  0x3f   :  { %v157_v56 = vld [vmem:[#allocation5 + $0x20] sm:$0xff]  ;;  %314 = vmatpush.msra.mxu1 %v225_v53  ;;  %v158_v58 = vld [vmem:[#allocation5 + $0x28] sm:$0xff]  ;;  %354 = vmatpush.msra.mxu3 %v226_v55  ;;  %v255_v27 = vld [vmem:[#allocation5 + $0x330] sm:$0xff] }
  0x40   :  { %v221_v57 = vld [vmem:[#allocation5 + $0x220] sm:$0xff]  ;;  %v222_v59 = vld [vmem:[#allocation5 + $0x228] sm:$0xff]  ;;  %295 = vmatpush.msra.mxu0 %v157_v56  ;;  %335 = vmatpush.msra.mxu2 %v158_v58  ;;  %v192_v28 = vld [vmem:[#allocation5 + $0x138] sm:$0xff] }
  0x41   :  { %v153_v60 = vld [vmem:[#allocation5] sm:$0xff]  ;;  %315 = vmatpush.msra.mxu1 %v221_v57  ;;  %v154_v62 = vld [vmem:[#allocation5 + $0x8] sm:$0xff]  ;;  %355 = vmatpush.msra.mxu3 %v222_v59  ;;  %v256_v29 = vld [vmem:[#allocation5 + $0x338] sm:$0xff] }
  0x42   :  { %v217_v61 = vld [vmem:[#allocation5 + $0x200] sm:$0xff]  ;;  %v218_v63 = vld [vmem:[#allocation5 + $0x208] sm:$0xff]  ;;  %296 = vmatpush.msra.mxu0 %v153_v60  ;;  %336 = vmatpush.msra.mxu2 %v154_v62  ;;  %v187_v30 = vld [vmem:[#allocation5 + $0x110] sm:$0xff] }
  0x43   :  { %316 = vmatpush.msra.mxu1 %v217_v61  ;;  %356 = vmatpush.msra.mxu3 %v218_v63  ;;  %v251_v31 = vld [vmem:[#allocation5 + $0x310] sm:$0xff]  ;;  %v188_v32 = vld [vmem:[#allocation5 + $0x118] sm:$0xff] }
  0x44   :  { %297 = vmatmul.f32.vlgmr.msra.gmra.mxu0 %v1766_v0  ;;  %317 = vmatmul.f32.vlgmr.msra.gmra.mxu1 %v1768_v1  ;;  %v252_v33 = vld [vmem:[#allocation5 + $0x318] sm:$0xff]  ;;  %v183_v34 = vld [vmem:[#allocation5 + $0xf0] sm:$0xff] }
  0x45   :  { %337 = vmatmul.f32.vlgmr.msra.gmra.mxu2 %v1766_v0  ;;  %357 = vmatmul.f32.vlgmr.msra.gmra.mxu3 %v1768_v1  ;;  %v247_v35 = vld [vmem:[#allocation5 + $0x2f0] sm:$0xff]  ;;  %v184_v36 = vld [vmem:[#allocation5 + $0xf8] sm:$0xff] }
  0x46   :  { %361 = vmatpush.msrb.mxu0 %v215_v2  ;;  %381 = vmatpush.msrb.mxu1 %v279_v3  ;;  %v248_v37 = vld [vmem:[#allocation5 + $0x2f8] sm:$0xff]  ;;  %v179_v38 = vld [vmem:[#allocation5 + $0xd0] sm:$0xff] }
  0x47   :  { %401 = vmatpush.msrb.mxu2 %v216_v4  ;;  %421 = vmatpush.msrb.mxu3 %v280_v5  ;;  %v243_v39 = vld [vmem:[#allocation5 + $0x2d0] sm:$0xff]  ;;  %v180_v40 = vld [vmem:[#allocation5 + $0xd8] sm:$0xff]  ;;  %v533_v4 = vld [vmem:[#allocation10 + $0x1e0] sm:$0xff] }
  0x48   :  { %362 = vmatpush.msrb.mxu0 %v211_v6  ;;  %382 = vmatpush.msrb.mxu1 %v275_v7  ;;  %v244_v41 = vld [vmem:[#allocation5 + $0x2d8] sm:$0xff]  ;;  %v175_v42 = vld [vmem:[#allocation5 + $0xb0] sm:$0xff]  ;;  %v597_v5 = vld [vmem:[#allocation10 + $0x3e0] sm:$0xff] }
  0x49   :  { %402 = vmatpush.msrb.mxu2 %v212_v8  ;;  %422 = vmatpush.msrb.mxu3 %v276_v9  ;;  %v239_v43 = vld [vmem:[#allocation5 + $0x2b0] sm:$0xff]  ;;  %v176_v44 = vld [vmem:[#allocation5 + $0xb8] sm:$0xff]  ;;  %v661_v6 = vld [vmem:[#allocation10 + $0x5e0] sm:$0xff] }
  0x4a   :  { %363 = vmatpush.msrb.mxu0 %v207_v10  ;;  %383 = vmatpush.msrb.mxu1 %v271_v11  ;;  %v240_v45 = vld [vmem:[#allocation5 + $0x2b8] sm:$0xff]  ;;  %v171_v46 = vld [vmem:[#allocation5 + $0x90] sm:$0xff]  ;;  %v529_v7 = vld [vmem:[#allocation10 + $0x1c0] sm:$0xff] }
  0x4b   :  { %403 = vmatpush.msrb.mxu2 %v208_v12  ;;  %423 = vmatpush.msrb.mxu3 %v272_v13  ;;  %v235_v47 = vld [vmem:[#allocation5 + $0x290] sm:$0xff]  ;;  %v172_v48 = vld [vmem:[#allocation5 + $0x98] sm:$0xff]  ;;  %v593_v8 = vld [vmem:[#allocation10 + $0x3c0] sm:$0xff] }
  0x4c   :  { %364 = vmatpush.msrb.mxu0 %v203_v14  ;;  %384 = vmatpush.msrb.mxu1 %v267_v15  ;;  %v236_v49 = vld [vmem:[#allocation5 + $0x298] sm:$0xff]  ;;  %v167_v50 = vld [vmem:[#allocation5 + $0x70] sm:$0xff]  ;;  %v657_v9 = vld [vmem:[#allocation10 + $0x5c0] sm:$0xff] }
  0x4d   :  { %404 = vmatpush.msrb.mxu2 %v204_v16  ;;  %424 = vmatpush.msrb.mxu3 %v268_v17  ;;  %v231_v51 = vld [vmem:[#allocation5 + $0x270] sm:$0xff]  ;;  %v168_v52 = vld [vmem:[#allocation5 + $0x78] sm:$0xff]  ;;  %v525_v10 = vld [vmem:[#allocation10 + $0x1a0] sm:$0xff] }
  0x4e   :  { %365 = vmatpush.msrb.mxu0 %v199_v18  ;;  %385 = vmatpush.msrb.mxu1 %v263_v19  ;;  %v232_v53 = vld [vmem:[#allocation5 + $0x278] sm:$0xff]  ;;  %v163_v54 = vld [vmem:[#allocation5 + $0x50] sm:$0xff]  ;;  %v589_v11 = vld [vmem:[#allocation10 + $0x3a0] sm:$0xff] }
  0x4f   :  { %405 = vmatpush.msrb.mxu2 %v200_v20  ;;  %425 = vmatpush.msrb.mxu3 %v264_v21  ;;  %v227_v55 = vld [vmem:[#allocation5 + $0x250] sm:$0xff]  ;;  %v164_v56 = vld [vmem:[#allocation5 + $0x58] sm:$0xff]  ;;  %v653_v12 = vld [vmem:[#allocation10 + $0x5a0] sm:$0xff] }
  0x50   :  { %366 = vmatpush.msrb.mxu0 %v195_v22  ;;  %386 = vmatpush.msrb.mxu1 %v259_v23  ;;  %v228_v57 = vld [vmem:[#allocation5 + $0x258] sm:$0xff]  ;;  %v159_v58 = vld [vmem:[#allocation5 + $0x30] sm:$0xff]  ;;  %v521_v13 = vld [vmem:[#allocation10 + $0x180] sm:$0xff] }
  0x51   :  { %406 = vmatpush.msrb.mxu2 %v196_v24  ;;  %426 = vmatpush.msrb.mxu3 %v260_v25  ;;  %v223_v59 = vld [vmem:[#allocation5 + $0x230] sm:$0xff]  ;;  %v160_v60 = vld [vmem:[#allocation5 + $0x38] sm:$0xff]  ;;  %v585_v14 = vld [vmem:[#allocation10 + $0x380] sm:$0xff] }
  0x52   :  { %367 = vmatpush.msrb.mxu0 %v191_v26  ;;  %387 = vmatpush.msrb.mxu1 %v255_v27  ;;  %v224_v61 = vld [vmem:[#allocation5 + $0x238] sm:$0xff]  ;;  %v155_v62 = vld [vmem:[#allocation5 + $0x10] sm:$0xff]  ;;  %v725_v15 = vld [vmem:[#allocation10 + $0x7e0] sm:$0xff] }
  0x53   :  { %407 = vmatpush.msrb.mxu2 %v192_v28  ;;  %427 = vmatpush.msrb.mxu3 %v256_v29  ;;  %v219_v63 = vld [vmem:[#allocation5 + $0x210] sm:$0xff]  ;;  %v156_v2 = vld [vmem:[#allocation5 + $0x18] sm:$0xff]  ;;  %v517_v16 = vld [vmem:[#allocation10 + $0x160] sm:$0xff] }
  0x54   :  { %368 = vmatpush.msrb.mxu0 %v187_v30  ;;  %388 = vmatpush.msrb.mxu1 %v251_v31  ;;  %v220_v3 = vld [vmem:[#allocation5 + $0x218] sm:$0xff]  ;;  %v721_v17 = vld [vmem:[#allocation10 + $0x7c0] sm:$0xff] }
  0x55   :  { %408 = vmatpush.msrb.mxu2 %v188_v32  ;;  %428 = vmatpush.msrb.mxu3 %v252_v33  ;;  %v645_v18 = vld [vmem:[#allocation10 + $0x560] sm:$0xff] }
  0x56   :  { %369 = vmatpush.msrb.mxu0 %v183_v34  ;;  %389 = vmatpush.msrb.mxu1 %v247_v35  ;;  %v513_v19 = vld [vmem:[#allocation10 + $0x140] sm:$0xff] }
  0x57   :  { %409 = vmatpush.msrb.mxu2 %v184_v36  ;;  %429 = vmatpush.msrb.mxu3 %v248_v37  ;;  %v577_v20 = vld [vmem:[#allocation10 + $0x340] sm:$0xff] }
  0x58   :  { %370 = vmatpush.msrb.mxu0 %v179_v38  ;;  %390 = vmatpush.msrb.mxu1 %v243_v39  ;;  %v717_v21 = vld [vmem:[#allocation10 + $0x7a0] sm:$0xff] }
  0x59   :  { %410 = vmatpush.msrb.mxu2 %v180_v40  ;;  %430 = vmatpush.msrb.mxu3 %v244_v41  ;;  %v641_v22 = vld [vmem:[#allocation10 + $0x540] sm:$0xff] }
  0x5a   :  { %371 = vmatpush.msrb.mxu0 %v175_v42  ;;  %391 = vmatpush.msrb.mxu1 %v239_v43  ;;  %v509_v23 = vld [vmem:[#allocation10 + $0x120] sm:$0xff] }
  0x5b   :  { %411 = vmatpush.msrb.mxu2 %v176_v44  ;;  %431 = vmatpush.msrb.mxu3 %v240_v45  ;;  %v573_v24 = vld [vmem:[#allocation10 + $0x320] sm:$0xff] }
  0x5c   :  { %372 = vmatpush.msrb.mxu0 %v171_v46  ;;  %392 = vmatpush.msrb.mxu1 %v235_v47  ;;  %v713_v25 = vld [vmem:[#allocation10 + $0x780] sm:$0xff] }
  0x5d   :  { %412 = vmatpush.msrb.mxu2 %v172_v48  ;;  %432 = vmatpush.msrb.mxu3 %v236_v49  ;;  %v637_v26 = vld [vmem:[#allocation10 + $0x520] sm:$0xff] }
  0x5e   :  { %373 = vmatpush.msrb.mxu0 %v167_v50  ;;  %393 = vmatpush.msrb.mxu1 %v231_v51  ;;  %v505_v27 = vld [vmem:[#allocation10 + $0x100] sm:$0xff] }
  0x5f   :  { %413 = vmatpush.msrb.mxu2 %v168_v52  ;;  %433 = vmatpush.msrb.mxu3 %v232_v53  ;;  %v569_v28 = vld [vmem:[#allocation10 + $0x300] sm:$0xff]  ;;  %v534_v53 = vld [vmem:[#allocation10 + $0x1e8] sm:$0xff] }
  0x60   :  { %374 = vmatpush.msrb.mxu0 %v163_v54  ;;  %394 = vmatpush.msrb.mxu1 %v227_v55  ;;  %v709_v29 = vld [vmem:[#allocation10 + $0x760] sm:$0xff]  ;;  %v598_v54 = vld [vmem:[#allocation10 + $0x3e8] sm:$0xff] }
  0x61   :  { %414 = vmatpush.msrb.mxu2 %v164_v56  ;;  %434 = vmatpush.msrb.mxu3 %v228_v57  ;;  %v633_v30 = vld [vmem:[#allocation10 + $0x500] sm:$0xff]  ;;  %v530_v55 = vld [vmem:[#allocation10 + $0x1c8] sm:$0xff] }
  0x62   :  { %375 = vmatpush.msrb.mxu0 %v159_v58  ;;  %395 = vmatpush.msrb.mxu1 %v223_v59  ;;  %v501_v31 = vld [vmem:[#allocation10 + $0xe0] sm:$0xff]  ;;  %v594_v56 = vld [vmem:[#allocation10 + $0x3c8] sm:$0xff] }
  0x63   :  { %415 = vmatpush.msrb.mxu2 %v160_v60  ;;  %435 = vmatpush.msrb.mxu3 %v224_v61  ;;  %v565_v32 = vld [vmem:[#allocation10 + $0x2e0] sm:$0xff]  ;;  %v526_v57 = vld [vmem:[#allocation10 + $0x1a8] sm:$0xff] }
  0x64   :  { %376 = vmatpush.msrb.mxu0 %v155_v62  ;;  %396 = vmatpush.msrb.mxu1 %v219_v63  ;;  %v705_v33 = vld [vmem:[#allocation10 + $0x740] sm:$0xff]  ;;  %v590_v58 = vld [vmem:[#allocation10 + $0x3a8] sm:$0xff] }
  0x65   :  { %416 = vmatpush.msrb.mxu2 %v156_v2  ;;  %436 = vmatpush.msrb.mxu3 %v220_v3  ;;  %v629_v34 = vld [vmem:[#allocation10 + $0x4e0] sm:$0xff]  ;;  %v522_v59 = vld [vmem:[#allocation10 + $0x188] sm:$0xff] }
  0x66   :  { %377 = vmatmul.f32.vlgmr.msrb.gmra.mxu0 %v1766_v0  ;;  %397 = vmatmul.f32.vlgmr.msrb.gmra.mxu1 %v1768_v1  ;;  %v497_v35 = vld [vmem:[#allocation10 + $0xc0] sm:$0xff]  ;;  %v586_v60 = vld [vmem:[#allocation10 + $0x388] sm:$0xff] }
  0x67   :  { %417 = vmatmul.f32.vlgmr.msrb.gmra.mxu2 %v1766_v0  ;;  %437 = vmatmul.f32.vlgmr.msrb.gmra.mxu3 %v1768_v1  ;;  %v649_v0 = vld [vmem:[#allocation10 + $0x580] sm:$0xff]  ;;  %v518_v61 = vld [vmem:[#allocation10 + $0x168] sm:$0xff] }
  0x68   :  { %729 = vmatpush.msra.mxu0 %v533_v4  ;;  %749 = vmatpush.msra.mxu1 %v597_v5  ;;  %v581_v1 = vld [vmem:[#allocation10 + $0x360] sm:$0xff]  ;;  %v582_v62 = vld [vmem:[#allocation10 + $0x368] sm:$0xff] }
  0x69   :  { %769 = vmatpush.msra.mxu2 %v661_v6  ;;  %789 = vmatpush.msra.mxu3 %v725_v15  ;;  %v561_v36 = vld [vmem:[#allocation10 + $0x2c0] sm:$0xff]  ;;  %v514_v63 = vld [vmem:[#allocation10 + $0x148] sm:$0xff] }
  0x6a   :  { %730 = vmatpush.msra.mxu0 %v529_v7  ;;  %750 = vmatpush.msra.mxu1 %v593_v8  ;;  %v701_v37 = vld [vmem:[#allocation10 + $0x720] sm:$0xff]  ;;  %v578_v2 = vld [vmem:[#allocation10 + $0x348] sm:$0xff] }
  0x6b   :  { %770 = vmatpush.msra.mxu2 %v657_v9  ;;  %790 = vmatpush.msra.mxu3 %v721_v17  ;;  %v625_v38 = vld [vmem:[#allocation10 + $0x4c0] sm:$0xff]  ;;  %v510_v3 = vld [vmem:[#allocation10 + $0x128] sm:$0xff] }
  0x6c   :  { %731 = vmatpush.msra.mxu0 %v525_v10  ;;  %751 = vmatpush.msra.mxu1 %v589_v11  ;;  %v493_v39 = vld [vmem:[#allocation10 + $0xa0] sm:$0xff]  ;;  %v574_v4 = vld [vmem:[#allocation10 + $0x328] sm:$0xff] }
  0x6d   :  { %771 = vmatpush.msra.mxu2 %v653_v12  ;;  %791 = vmatpush.msra.mxu3 %v717_v21  ;;  %v557_v40 = vld [vmem:[#allocation10 + $0x2a0] sm:$0xff]  ;;  %v506_v5 = vld [vmem:[#allocation10 + $0x108] sm:$0xff] }
  0x6e   :  { %732 = vmatpush.msra.mxu0 %v521_v13  ;;  %752 = vmatpush.msra.mxu1 %v585_v14  ;;  %v697_v41 = vld [vmem:[#allocation10 + $0x700] sm:$0xff]  ;;  %v570_v6 = vld [vmem:[#allocation10 + $0x308] sm:$0xff] }
  0x6f   :  { %772 = vmatpush.msra.mxu2 %v649_v0  ;;  %792 = vmatpush.msra.mxu3 %v713_v25  ;;  %v621_v42 = vld [vmem:[#allocation10 + $0x4a0] sm:$0xff]  ;;  %v502_v7 = vld [vmem:[#allocation10 + $0xe8] sm:$0xff] }
  0x70   :  { %733 = vmatpush.msra.mxu0 %v517_v16  ;;  %753 = vmatpush.msra.mxu1 %v581_v1  ;;  %v489_v43 = vld [vmem:[#allocation10 + $0x80] sm:$0xff]  ;;  %v498_v8 = vld [vmem:[#allocation10 + $0xc8] sm:$0xff] }
  0x71   :  { %773 = vmatpush.msra.mxu2 %v645_v18  ;;  %793 = vmatpush.msra.mxu3 %v709_v29  ;;  %v553_v44 = vld [vmem:[#allocation10 + $0x280] sm:$0xff]  ;;  %v494_v9 = vld [vmem:[#allocation10 + $0xa8] sm:$0xff] }
  0x72   :  { %734 = vmatpush.msra.mxu0 %v513_v19  ;;  %754 = vmatpush.msra.mxu1 %v577_v20  ;;  %v485_v45 = vld [vmem:[#allocation10 + $0x60] sm:$0xff]  ;;  %v490_v12 = vld [vmem:[#allocation10 + $0x88] sm:$0xff] }
  0x73   :  { %774 = vmatpush.msra.mxu2 %v641_v22  ;;  %794 = vmatpush.msra.mxu3 %v705_v33  ;;  %v549_v46 = vld [vmem:[#allocation10 + $0x260] sm:$0xff]  ;;  %v566_v13 = vld [vmem:[#allocation10 + $0x2e8] sm:$0xff] }
  0x74   :  { %735 = vmatpush.msra.mxu0 %v509_v23  ;;  %755 = vmatpush.msra.mxu1 %v573_v24  ;;  %v481_v47 = vld [vmem:[#allocation10 + $0x40] sm:$0xff]  ;;  %v486_v0 = vld [vmem:[#allocation10 + $0x68] sm:$0xff] }
  0x75   :  { %775 = vmatpush.msra.mxu2 %v637_v26  ;;  %795 = vmatpush.msra.mxu3 %v701_v37  ;;  %v545_v48 = vld [vmem:[#allocation10 + $0x240] sm:$0xff]  ;;  %v562_v16 = vld [vmem:[#allocation10 + $0x2c8] sm:$0xff] }
  0x76   :  { %736 = vmatpush.msra.mxu0 %v505_v27  ;;  %756 = vmatpush.msra.mxu1 %v569_v28  ;;  %v477_v49 = vld [vmem:[#allocation10 + $0x20] sm:$0xff]  ;;  %v482_v18 = vld [vmem:[#allocation10 + $0x48] sm:$0xff] }
  0x77   :  { %776 = vmatpush.msra.mxu2 %v633_v30  ;;  %796 = vmatpush.msra.mxu3 %v697_v41  ;;  %v541_v50 = vld [vmem:[#allocation10 + $0x220] sm:$0xff]  ;;  %v558_v19 = vld [vmem:[#allocation10 + $0x2a8] sm:$0xff] }
  0x78   :  { %737 = vmatpush.msra.mxu0 %v501_v31  ;;  %757 = vmatpush.msra.mxu1 %v565_v32  ;;  %v473_v51 = vld [vmem:[#allocation10] sm:$0xff]  ;;  %v478_v22 = vld [vmem:[#allocation10 + $0x28] sm:$0xff] }
  0x79   :  { %777 = vmatpush.msra.mxu2 %v629_v34  ;;  %v537_v52 = vld [vmem:[#allocation10 + $0x200] sm:$0xff]  ;;  %v554_v23 = vld [vmem:[#allocation10 + $0x288] sm:$0xff] }
  0x7a   :  { %738 = vmatpush.msra.mxu0 %v497_v35  ;;  %758 = vmatpush.msra.mxu1 %v561_v36  ;;  %v617_v10 = vld [vmem:[#allocation10 + $0x480] sm:$0xff]  ;;  %v474_v26 = vld [vmem:[#allocation10 + $0x8] sm:$0xff] }
  0x7b   :  { %778 = vmatpush.msra.mxu2 %v625_v38  ;;  %v693_v11 = vld [vmem:[#allocation10 + $0x6e0] sm:$0xff]  ;;  %v550_v27 = vld [vmem:[#allocation10 + $0x268] sm:$0xff] }
  0x7c   :  { %739 = vmatpush.msra.mxu0 %v493_v39  ;;  %759 = vmatpush.msra.mxu1 %v557_v40  ;;  %v613_v14 = vld [vmem:[#allocation10 + $0x460] sm:$0xff]  ;;  %v662_v28 = vld [vmem:[#allocation10 + $0x5e8] sm:$0xff] }
  0x7d   :  { %779 = vmatpush.msra.mxu2 %v621_v42  ;;  %797 = vmatpush.msra.mxu3 %v693_v11  ;;  %v689_v15 = vld [vmem:[#allocation10 + $0x6c0] sm:$0xff]  ;;  %v546_v30 = vld [vmem:[#allocation10 + $0x248] sm:$0xff] }
  0x7e   :  { %740 = vmatpush.msra.mxu0 %v489_v43  ;;  %760 = vmatpush.msra.mxu1 %v553_v44  ;;  %v609_v1 = vld [vmem:[#allocation10 + $0x440] sm:$0xff]  ;;  %v658_v31 = vld [vmem:[#allocation10 + $0x5c8] sm:$0xff] }
  0x7f   :  { %780 = vmatpush.msra.mxu2 %v617_v10  ;;  %798 = vmatpush.msra.mxu3 %v689_v15  ;;  %v685_v17 = vld [vmem:[#allocation10 + $0x6a0] sm:$0xff]  ;;  %v542_v33 = vld [vmem:[#allocation10 + $0x228] sm:$0xff]  ;;  %v535_v10 = vld [vmem:[#allocation10 + $0x1f0] sm:$0xff] }
  0x80   :  { %741 = vmatpush.msra.mxu0 %v485_v45  ;;  %761 = vmatpush.msra.mxu1 %v549_v46  ;;  %v605_v20 = vld [vmem:[#allocation10 + $0x420] sm:$0xff]  ;;  %v654_v34 = vld [vmem:[#allocation10 + $0x5a8] sm:$0xff]  ;;  %v531_v15 = vld [vmem:[#allocation10 + $0x1d0] sm:$0xff] }
  0x81   :  { %781 = vmatpush.msra.mxu2 %v613_v14  ;;  %799 = vmatpush.msra.mxu3 %v685_v17  ;;  %v681_v21 = vld [vmem:[#allocation10 + $0x680] sm:$0xff]  ;;  %v538_v36 = vld [vmem:[#allocation10 + $0x208] sm:$0xff]  ;;  %v527_v17 = vld [vmem:[#allocation10 + $0x1b0] sm:$0xff] }
  0x82   :  { %742 = vmatpush.msra.mxu0 %v481_v47  ;;  %762 = vmatpush.msra.mxu1 %v545_v48  ;;  %v601_v24 = vld [vmem:[#allocation10 + $0x400] sm:$0xff]  ;;  %v650_v37 = vld [vmem:[#allocation10 + $0x588] sm:$0xff] }
  0x83   :  { %782 = vmatpush.msra.mxu2 %v609_v1  ;;  %800 = vmatpush.msra.mxu3 %v681_v21  ;;  %v677_v25 = vld [vmem:[#allocation10 + $0x660] sm:$0xff]  ;;  %v726_v38 = vld [vmem:[#allocation10 + $0x7e8] sm:$0xff] }
  0x84   :  { %743 = vmatpush.msra.mxu0 %v477_v49  ;;  %763 = vmatpush.msra.mxu1 %v541_v50  ;;  %v673_v29 = vld [vmem:[#allocation10 + $0x640] sm:$0xff]  ;;  %v722_v39 = vld [vmem:[#allocation10 + $0x7c8] sm:$0xff]  ;;  %v1778_v49 = vld [vmem:[#allocation7] sm:$0xf] }
  0x85   :  { %783 = vmatpush.msra.mxu2 %v605_v20  ;;  %801 = vmatpush.msra.mxu3 %v677_v25  ;;  %v669_v32 = vld [vmem:[#allocation10 + $0x620] sm:$0xff]  ;;  %v646_v40 = vld [vmem:[#allocation10 + $0x568] sm:$0xff]  ;;  %v523_v20 = vld [vmem:[#allocation10 + $0x190] sm:$0xff] }
  0x86   :  { %744 = vmatpush.msra.mxu0 %v473_v51  ;;  %764 = vmatpush.msra.mxu1 %v537_v52  ;;  %v665_v35 = vld [vmem:[#allocation10 + $0x600] sm:$0xff]  ;;  %v718_v41 = vld [vmem:[#allocation10 + $0x7a8] sm:$0xff]  ;;  %v1780_v52 = vld [vmem:[#allocation8] sm:$0xf] }
  0x87   :  { %784 = vmatpush.msra.mxu2 %v601_v24  ;;  %802 = vmatpush.msra.mxu3 %v673_v29  ;;  %v642_v42 = vld [vmem:[#allocation10 + $0x548] sm:$0xff]  ;;  %v519_v24 = vld [vmem:[#allocation10 + $0x170] sm:$0xff] }
  0x88   :  { %809 = vmatpush.msrb.mxu0 %v534_v53  ;;  %829 = vmatpush.msrb.mxu1 %v598_v54  ;;  %v714_v43 = vld [vmem:[#allocation10 + $0x788] sm:$0xff]  ;;  %v443_v54 = vperm.slane %v1778_v49, 0  ;;  %v595_v25 = vld [vmem:[#allocation10 + $0x3d0] sm:$0xff] }
  0x89   :  { %849 = vmatpush.msrb.mxu2 %v662_v28  ;;  %803 = vmatpush.msra.mxu3 %v669_v32  ;;  %v638_v44 = vld [vmem:[#allocation10 + $0x528] sm:$0xff]  ;;  %v591_v28 = vld [vmem:[#allocation10 + $0x3b0] sm:$0xff] }
  0x8a   :  { %810 = vmatpush.msrb.mxu0 %v530_v55  ;;  %830 = vmatpush.msrb.mxu1 %v594_v56  ;;  %v710_v45 = vld [vmem:[#allocation10 + $0x768] sm:$0xff]  ;;  %v511_v29 = vld [vmem:[#allocation10 + $0x130] sm:$0xff] }
  0x8b   :  { %850 = vmatpush.msrb.mxu2 %v658_v31  ;;  %804 = vmatpush.msra.mxu3 %v665_v35  ;;  %v634_v46 = vld [vmem:[#allocation10 + $0x508] sm:$0xff]  ;;  %v507_v31 = vld [vmem:[#allocation10 + $0x110] sm:$0xff] }
  0x8c   :  { %811 = vmatpush.msrb.mxu0 %v526_v57  ;;  %831 = vmatpush.msrb.mxu1 %v590_v58  ;;  %v706_v47 = vld [vmem:[#allocation10 + $0x748] sm:$0xff]  ;;  %v583_v32 = vld [vmem:[#allocation10 + $0x370] sm:$0xff] }
  0x8d   :  { %851 = vmatpush.msrb.mxu2 %v654_v34  ;;  %869 = vmatpush.msrb.mxu3 %v726_v38  ;;  %v630_v48 = vld [vmem:[#allocation10 + $0x4e8] sm:$0xff]  ;;  %v579_v34 = vld [vmem:[#allocation10 + $0x350] sm:$0xff] }
  0x8e   :  { %812 = vmatpush.msrb.mxu0 %v522_v59  ;;  %832 = vmatpush.msrb.mxu1 %v586_v60  ;;  %v702_v50 = vld [vmem:[#allocation10 + $0x728] sm:$0xff]  ;;  %v457_v59 = vperm.slane %v1780_v52, 0  ;;  %v499_v35 = vld [vmem:[#allocation10 + $0xd0] sm:$0xff] }
  0x8f   :  { %852 = vmatpush.msrb.mxu2 %v650_v37  ;;  %870 = vmatpush.msrb.mxu3 %v722_v39  ;;  %v626_v51 = vld [vmem:[#allocation10 + $0x4c8] sm:$0xff]  ;;  %v495_v37 = vld [vmem:[#allocation10 + $0xb0] sm:$0xff] }
  0x90   :  { %813 = vmatpush.msrb.mxu0 %v518_v61  ;;  %833 = vmatpush.msrb.mxu1 %v582_v62  ;;  %v698_v53 = vld [vmem:[#allocation10 + $0x708] sm:$0xff]  ;;  %v571_v38 = vld [vmem:[#allocation10 + $0x310] sm:$0xff] }
  0x91   :  { %853 = vmatpush.msrb.mxu2 %v646_v40  ;;  %871 = vmatpush.msrb.mxu3 %v718_v41  ;;  %v622_v55 = vld [vmem:[#allocation10 + $0x4a8] sm:$0xff]  ;;  %v491_v39 = vld [vmem:[#allocation10 + $0x90] sm:$0xff] }
  0x92   :  { %814 = vmatpush.msrb.mxu0 %v514_v63  ;;  %834 = vmatpush.msrb.mxu1 %v578_v2  ;;  %v618_v60 = vld [vmem:[#allocation10 + $0x488] sm:$0xff]  ;;  %v567_v40 = vld [vmem:[#allocation10 + $0x2f0] sm:$0xff] }
  0x93   :  { %854 = vmatpush.msrb.mxu2 %v642_v42  ;;  %872 = vmatpush.msrb.mxu3 %v714_v43  ;;  %v694_v61 = vld [vmem:[#allocation10 + $0x6e8] sm:$0xff]  ;;  %v487_v41 = vld [vmem:[#allocation10 + $0x70] sm:$0xff]  ;;  %v445_v43 = vperm.slane %v1778_v49, 2 }
  0x94   :  { %815 = vmatpush.msrb.mxu0 %v510_v3  ;;  %835 = vmatpush.msrb.mxu1 %v574_v4  ;;  %v614_v63 = vld [vmem:[#allocation10 + $0x468] sm:$0xff]  ;;  %v444_v4 = vperm.slane %v1778_v49, 1  ;;  %v563_v42 = vld [vmem:[#allocation10 + $0x2d0] sm:$0xff] }
  0x95   :  { %855 = vmatpush.msrb.mxu2 %v638_v44  ;;  %873 = vmatpush.msrb.mxu3 %v710_v45  ;;  %v690_v2 = vld [vmem:[#allocation10 + $0x6c8] sm:$0xff]  ;;  %v483_v44 = vld [vmem:[#allocation10 + $0x50] sm:$0xff] }
  0x96   :  { %816 = vmatpush.msrb.mxu0 %v506_v5  ;;  %836 = vmatpush.msrb.mxu1 %v570_v6  ;;  %v610_v5 = vld [vmem:[#allocation10 + $0x448] sm:$0xff] }
  0x97   :  { %856 = vmatpush.msrb.mxu2 %v634_v46  ;;  %874 = vmatpush.msrb.mxu3 %v706_v47  ;;  %v686_v6 = vld [vmem:[#allocation10 + $0x6a8] sm:$0xff]  ;;  %v559_v47 = vld [vmem:[#allocation10 + $0x2b0] sm:$0xff] }
  0x98   :  { %817 = vmatpush.msrb.mxu0 %v502_v7  ;;  %837 = vmatpush.msrb.mxu1 %v566_v13  ;;  %v606_v13 = vld [vmem:[#allocation10 + $0x428] sm:$0xff] }
  0x99   :  { %857 = vmatpush.msrb.mxu2 %v630_v48  ;;  %875 = vmatpush.msrb.mxu3 %v702_v50  ;;  %v682_v14 = vld [vmem:[#allocation10 + $0x688] sm:$0xff]  ;;  %v459_v50 = vperm.slane %v1780_v52, 2 }
  0x9a   :  { %818 = vmatpush.msrb.mxu0 %v498_v8  ;;  %838 = vmatpush.msrb.mxu1 %v562_v16  ;;  %v602_v16 = vld [vmem:[#allocation10 + $0x408] sm:$0xff] }
  0x9b   :  { %858 = vmatpush.msrb.mxu2 %v626_v51  ;;  %876 = vmatpush.msrb.mxu3 %v698_v53  ;;  %v678_v1 = vld [vmem:[#allocation10 + $0x668] sm:$0xff]  ;;  %v479_v51 = vld [vmem:[#allocation10 + $0x30] sm:$0xff] }
  0x9c   :  { %819 = vmatpush.msrb.mxu0 %v494_v9  ;;  %839 = vmatpush.msrb.mxu1 %v558_v19  ;;  %v674_v19 = vld [vmem:[#allocation10 + $0x648] sm:$0xff]  ;;  %v555_v53 = vld [vmem:[#allocation10 + $0x290] sm:$0xff] }
  0x9d   :  { %859 = vmatpush.msrb.mxu2 %v622_v55  ;;  %877 = vmatpush.msrb.mxu3 %v694_v61  ;;  %v475_v55 = vld [vmem:[#allocation10 + $0x10] sm:$0xff] }
  0x9e   :  { %820 = vmatpush.msrb.mxu0 %v490_v12  ;;  %840 = vmatpush.msrb.mxu1 %v554_v23  ;;  %v458_v12 = vperm.slane %v1780_v52, 1  ;;  %v670_v23 = vld [vmem:[#allocation10 + $0x628] sm:$0xff] }
  0x9f   :  { %860 = vmatpush.msrb.mxu2 %v618_v60  ;;  %878 = vmatpush.msrb.mxu3 %v690_v2  ;;  %v547_v60 = vld [vmem:[#allocation10 + $0x250] sm:$0xff] }
  0xa0   :  { %821 = vmatpush.msrb.mxu0 %v486_v0  ;;  %841 = vmatpush.msrb.mxu1 %v550_v27  ;;  %v515_v27 = vld [vmem:[#allocation10 + $0x150] sm:$0xff] }
  0xa1   :  { %861 = vmatpush.msrb.mxu2 %v614_v63  ;;  %879 = vmatpush.msrb.mxu3 %v686_v6  ;;  %v663_v2 = vld [vmem:[#allocation10 + $0x5f0] sm:$0xff] }
  0xa2   :  { %822 = vmatpush.msrb.mxu0 %v482_v18  ;;  %842 = vmatpush.msrb.mxu1 %v546_v30  ;;  %v587_v30 = vld [vmem:[#allocation10 + $0x390] sm:$0xff] }
  0xa3   :  { %862 = vmatpush.msrb.mxu2 %v610_v5  ;;  %880 = vmatpush.msrb.mxu3 %v682_v14  ;;  %v460_v5 = vperm.slane %v1780_v52, 3  ;;  %v543_v6 = vld [vmem:[#allocation10 + $0x230] sm:$0xff]  ;;  %v600_v14 = vld [vmem:[#allocation10 + $0x3f8] sm:$0xff] }
  0xa4   :  { %823 = vmatpush.msrb.mxu0 %v478_v22  ;;  %843 = vmatpush.msrb.mxu1 %v542_v33  ;;  %v599_v22 = vld [vmem:[#allocation10 + $0x3f0] sm:$0xff] }
  0xa5   :  { %863 = vmatpush.msrb.mxu2 %v606_v13  ;;  %881 = vmatpush.msrb.mxu3 %v678_v1  ;;  %v503_v33 = vld [vmem:[#allocation10 + $0xf0] sm:$0xff]  ;;  %v524_v13 = vld [vmem:[#allocation10 + $0x198] sm:$0xff] }
  0xa6   :  { %824 = vmatpush.msrb.mxu0 %v474_v26  ;;  %844 = vmatpush.msrb.mxu1 %v538_v36  ;;  %v666_v26 = vld [vmem:[#allocation10 + $0x608] sm:$0xff]  ;;  %v575_v36 = vld [vmem:[#allocation10 + $0x330] sm:$0xff]  ;;  %v520_v1 = vld [vmem:[#allocation10 + $0x178] sm:$0xff] }
  0xa7   :  { %864 = vmatpush.msrb.mxu2 %v602_v16  ;;  %882 = vmatpush.msrb.mxu3 %v674_v19  ;;  %v651_v52 = vld [vmem:[#allocation10 + $0x590] sm:$0xff] }
  0xa8   :  { %v647_v16 = vld [vmem:[#allocation10 + $0x570] sm:$0xff] }
  0xa9   :  { %883 = vmatpush.msrb.mxu3 %v670_v23  ;;  %v643_v19 = vld [vmem:[#allocation10 + $0x550] sm:$0xff]  ;;  %v592_v23 = vld [vmem:[#allocation10 + $0x3b8] sm:$0xff] }
  0xab   :  { %884 = vmatpush.msrb.mxu3 %v666_v26  ;;  %v715_v26 = vld [vmem:[#allocation10 + $0x790] sm:$0xff] }
  0xc1   :  { %v298_v56 = vpop.f32.mrf.mxu0  ;;  %v318_v57 = vpop.f32.mrf.mxu1 }
  0xc2   :  { %v319_v58 = vadd.f32 %v318_v57, %v298_v56  ;;  %v551_v56 = vld [vmem:[#allocation10 + $0x270] sm:$0xff] }
  0xc4   :  { %v451_v62 = vmul.f32 %v443_v54, %v319_v58  ;;  %v536_v58 = vld [vmem:[#allocation10 + $0x1f8] sm:$0xff] }
  0xc6   :  { %v465_v3 = vadd.f32 %v457_v59, %v451_v62  ;;  %v446_v59 = vperm.slane %v1778_v49, 3  ;;  %v659_v49 = vld [vmem:[#allocation10 + $0x5d0] sm:$0xff] }
  0xc8   :  { %v1785_v7 = vmax.f32 %v465_v3, 0.0  ;;  %v338_v8 = vpop.f32.mrf.mxu2  ;;  %v358_v9 = vpop.f32.mrf.mxu3  ;;  %v532_v3 = vld [vmem:[#allocation10 + $0x1d8] sm:$0xff] }
  0xc9   :  { %v359_v11 = vadd.f32 %v358_v9, %v338_v8  ;;  %v528_v8 = vld [vmem:[#allocation10 + $0x1b8] sm:$0xff] }
  0xca   :  { %745 = vmatmul.f32.vlgmr.msra.gmra.mxu0 %v1785_v7 }
  0xcb   :  { %v452_v0 = vmul.f32 %v444_v4, %v359_v11  ;;  %889 = vmatpush.msra.mxu0 %v535_v10  ;;  %v539_v10 = vld [vmem:[#allocation10 + $0x210] sm:$0xff] }
  0xcc   :  { %v655_v11 = vld [vmem:[#allocation10 + $0x5b0] sm:$0xff] }
  0xcd   :  { %v466_v18 = vadd.f32 %v458_v12, %v452_v0  ;;  %890 = vmatpush.msra.mxu0 %v531_v15  ;;  %v727_v0 = vld [vmem:[#allocation10 + $0x7f0] sm:$0xff] }
  0xcf   :  { %v1789_v21 = vmax.f32 %v466_v18, 0.0  ;;  %891 = vmatpush.msra.mxu0 %v527_v17  ;;  %v723_v17 = vld [vmem:[#allocation10 + $0x7d0] sm:$0xff]  ;;  %v596_v18 = vld [vmem:[#allocation10 + $0x3d8] sm:$0xff] }
  0xd1   :  { %765 = vmatmul.f32.vlgmr.msra.gmra.mxu1 %v1789_v21  ;;  %892 = vmatpush.msra.mxu0 %v523_v20  ;;  %v516_v20 = vld [vmem:[#allocation10 + $0x158] sm:$0xff] }
  0xd2   :  { %909 = vmatpush.msra.mxu1 %v599_v22  ;;  %825 = vmatmul.f32.vlgmr.msrb.gmra.mxu0 %v1785_v7  ;;  %v719_v22 = vld [vmem:[#allocation10 + $0x7b0] sm:$0xff] }
  0xd3   :  { %893 = vmatpush.msra.mxu0 %v519_v24  ;;  %v639_v24 = vld [vmem:[#allocation10 + $0x530] sm:$0xff] }
  0xd4   :  { %910 = vmatpush.msra.mxu1 %v595_v25  ;;  %v512_v25 = vld [vmem:[#allocation10 + $0x138] sm:$0xff] }
  0xd5   :  { %894 = vmatpush.msra.mxu0 %v515_v27  ;;  %v588_v27 = vld [vmem:[#allocation10 + $0x398] sm:$0xff] }
  0xd6   :  { %911 = vmatpush.msra.mxu1 %v591_v28  ;;  %v635_v28 = vld [vmem:[#allocation10 + $0x510] sm:$0xff] }
  0xd7   :  { %895 = vmatpush.msra.mxu0 %v511_v29  ;;  %v711_v29 = vld [vmem:[#allocation10 + $0x770] sm:$0xff] }
  0xd8   :  { %912 = vmatpush.msra.mxu1 %v587_v30  ;;  %v508_v30 = vld [vmem:[#allocation10 + $0x118] sm:$0xff] }
  0xd9   :  { %896 = vmatpush.msra.mxu0 %v507_v31  ;;  %845 = vmatmul.f32.vlgmr.msrb.gmra.mxu1 %v1789_v21  ;;  %v584_v31 = vld [vmem:[#allocation10 + $0x378] sm:$0xff] }
  0xda   :  { %913 = vmatpush.msra.mxu1 %v583_v32  ;;  %v631_v32 = vld [vmem:[#allocation10 + $0x4f0] sm:$0xff] }
  0xdb   :  { %897 = vmatpush.msra.mxu0 %v503_v33  ;;  %v707_v33 = vld [vmem:[#allocation10 + $0x750] sm:$0xff] }
  0xdc   :  { %914 = vmatpush.msra.mxu1 %v579_v34  ;;  %v504_v34 = vld [vmem:[#allocation10 + $0xf8] sm:$0xff] }
  0xdd   :  { %898 = vmatpush.msra.mxu0 %v499_v35  ;;  %v580_v35 = vld [vmem:[#allocation10 + $0x358] sm:$0xff] }
  0xde   :  { %915 = vmatpush.msra.mxu1 %v575_v36  ;;  %v627_v36 = vld [vmem:[#allocation10 + $0x4d0] sm:$0xff] }
  0xdf   :  { %899 = vmatpush.msra.mxu0 %v495_v37  ;;  %v703_v37 = vld [vmem:[#allocation10 + $0x730] sm:$0xff] }
  0xe0   :  { %916 = vmatpush.msra.mxu1 %v571_v38  ;;  %v500_v38 = vld [vmem:[#allocation10 + $0xd8] sm:$0xff] }
  0xe1   :  { %900 = vmatpush.msra.mxu0 %v491_v39  ;;  %v576_v39 = vld [vmem:[#allocation10 + $0x338] sm:$0xff] }
  0xe2   :  { %917 = vmatpush.msra.mxu1 %v567_v40  ;;  %v623_v40 = vld [vmem:[#allocation10 + $0x4b0] sm:$0xff] }
  0xe3   :  { %v378_v45 = vpop.f32.mrf.mxu0  ;;  %v398_v46 = vpop.f32.mrf.mxu1  ;;  %901 = vmatpush.msra.mxu0 %v487_v41  ;;  %v699_v41 = vld [vmem:[#allocation10 + $0x710] sm:$0xff] }
  0xe4   :  { %v399_v48 = vadd.f32 %v398_v46, %v378_v45  ;;  %918 = vmatpush.msra.mxu1 %v563_v42  ;;  %v496_v42 = vld [vmem:[#allocation10 + $0xb8] sm:$0xff]  ;;  %v695_v45 = vld [vmem:[#allocation10 + $0x6f0] sm:$0xff] }
  0xe5   :  { %902 = vmatpush.msra.mxu0 %v483_v44  ;;  %v619_v44 = vld [vmem:[#allocation10 + $0x490] sm:$0xff]  ;;  %v492_v46 = vld [vmem:[#allocation10 + $0x98] sm:$0xff] }
  0xe6   :  { %v453_v54 = vmul.f32 %v445_v43, %v399_v48  ;;  %919 = vmatpush.msra.mxu1 %v559_v47  ;;  %v572_v43 = vld [vmem:[#allocation10 + $0x318] sm:$0xff]  ;;  %v615_v48 = vld [vmem:[#allocation10 + $0x470] sm:$0xff] }
  0xe7   :  { %903 = vmatpush.msra.mxu0 %v479_v51  ;;  %v568_v47 = vld [vmem:[#allocation10 + $0x2f8] sm:$0xff] }
  0xe8   :  { %v467_v57 = vadd.f32 %v459_v50, %v453_v54  ;;  %920 = vmatpush.msra.mxu1 %v555_v53  ;;  %v691_v50 = vld [vmem:[#allocation10 + $0x6d0] sm:$0xff]  ;;  %v488_v51 = vld [vmem:[#allocation10 + $0x78] sm:$0xff] }
  0xe9   :  { %904 = vmatpush.msra.mxu0 %v475_v55  ;;  %v564_v53 = vld [vmem:[#allocation10 + $0x2d8] sm:$0xff]  ;;  %v611_v54 = vld [vmem:[#allocation10 + $0x450] sm:$0xff] }
  0xea   :  { %v1797_v61 = vmax.f32 %v467_v57, 0.0  ;;  %v418_v62 = vpop.f32.mrf.mxu2  ;;  %v438_v63 = vpop.f32.mrf.mxu3  ;;  %921 = vmatpush.msra.mxu1 %v551_v56  ;;  %905 = vmatmul.f32.vlgmr.msra.gmra.mxu0 %v1785_v7  ;;  %v687_v55 = vld [vmem:[#allocation10 + $0x6b0] sm:$0xff]  ;;  %v484_v56 = vld [vmem:[#allocation10 + $0x58] sm:$0xff] }
  0xeb   :  { %v439_v4 = vadd.f32 %v438_v63, %v418_v62  ;;  %969 = vmatpush.msrb.mxu0 %v536_v58  ;;  %v560_v57 = vld [vmem:[#allocation10 + $0x2b8] sm:$0xff]  ;;  %v607_v58 = vld [vmem:[#allocation10 + $0x430] sm:$0xff] }
  0xec   :  { %785 = vmatmul.f32.vlgmr.msra.gmra.mxu2 %v1797_v61  ;;  %922 = vmatpush.msra.mxu1 %v547_v60  ;;  %v480_v60 = vld [vmem:[#allocation10 + $0x38] sm:$0xff]  ;;  %v603_v63 = vld [vmem:[#allocation10 + $0x410] sm:$0xff] }
  0xed   :  { %v454_v9 = vmul.f32 %v446_v59, %v439_v4  ;;  %929 = vmatpush.msra.mxu2 %v663_v2  ;;  %970 = vmatpush.msrb.mxu0 %v532_v3  ;;  %v683_v59 = vld [vmem:[#allocation10 + $0x690] sm:$0xff]  ;;  %v556_v62 = vld [vmem:[#allocation10 + $0x298] sm:$0xff] }
  0xee   :  { %923 = vmatpush.msra.mxu1 %v543_v6  ;;  %v679_v2 = vld [vmem:[#allocation10 + $0x670] sm:$0xff]  ;;  %v476_v3 = vld [vmem:[#allocation10 + $0x18] sm:$0xff] }
  0xef   :  { %v468_v12 = vadd.f32 %v460_v5, %v454_v9  ;;  %930 = vmatpush.msra.mxu2 %v659_v49  ;;  %971 = vmatpush.msrb.mxu0 %v528_v8  ;;  %v552_v4 = vld [vmem:[#allocation10 + $0x278] sm:$0xff]  ;;  %v675_v6 = vld [vmem:[#allocation10 + $0x650] sm:$0xff]  ;;  %v1141_v9 = vld [vmem:[#allocation13 + $0x1e0] sm:$0xff] }
  0xf0   :  { %924 = vmatpush.msra.mxu1 %v539_v10  ;;  %v664_v5 = vld [vmem:[#allocation10 + $0x5f8] sm:$0xff]  ;;  %v671_v10 = vld [vmem:[#allocation10 + $0x630] sm:$0xff] }
  0xf1   :  { %v1802_v15 = vmax.f32 %v468_v12, 0.0  ;;  %931 = vmatpush.msra.mxu2 %v655_v11  ;;  %925 = vmatmul.f32.vlgmr.msra.gmra.mxu1 %v1789_v21  ;;  %v548_v49 = vld [vmem:[#allocation10 + $0x258] sm:$0xff] }
  0xf2   :  { %972 = vmatpush.msrb.mxu0 %v524_v13  ;;  %989 = vmatpush.msrb.mxu1 %v600_v14  ;;  %v660_v8 = vld [vmem:[#allocation10 + $0x5d8] sm:$0xff]  ;;  %v1137_v13 = vld [vmem:[#allocation13 + $0x1c0] sm:$0xff]  ;;  %v667_v14 = vld [vmem:[#allocation10 + $0x610] sm:$0xff] }
  0xf3   :  { %805 = vmatmul.f32.vlgmr.msra.gmra.mxu3 %v1802_v15  ;;  %932 = vmatpush.msra.mxu2 %v651_v52  ;;  %v544_v11 = vld [vmem:[#allocation10 + $0x238] sm:$0xff] }
  0xf4   :  { %949 = vmatpush.msra.mxu3 %v727_v0  ;;  %865 = vmatmul.f32.vlgmr.msrb.gmra.mxu2 %v1797_v61  ;;  %v656_v12 = vld [vmem:[#allocation10 + $0x5b8] sm:$0xff] }
  0xf5   :  { %933 = vmatpush.msra.mxu2 %v647_v16  ;;  %973 = vmatpush.msrb.mxu0 %v520_v1  ;;  %v540_v52 = vld [vmem:[#allocation10 + $0x218] sm:$0xff]  ;;  %v1133_v1 = vld [vmem:[#allocation13 + $0x1a0] sm:$0xff] }
  0xf6   :  { %950 = vmatpush.msra.mxu3 %v723_v17  ;;  %990 = vmatpush.msrb.mxu1 %v596_v18  ;;  %v652_v0 = vld [vmem:[#allocation10 + $0x598] sm:$0xff] }
  0xf7   :  { %934 = vmatpush.msra.mxu2 %v643_v19  ;;  %974 = vmatpush.msrb.mxu0 %v516_v20  ;;  %v728_v16 = vld [vmem:[#allocation10 + $0x7f8] sm:$0xff]  ;;  %v1201_v19 = vld [vmem:[#allocation13 + $0x3c0] sm:$0xff] }
  0xf8   :  { %951 = vmatpush.msra.mxu3 %v719_v22  ;;  %991 = vmatpush.msrb.mxu1 %v592_v23  ;;  %v648_v17 = vld [vmem:[#allocation10 + $0x578] sm:$0xff]  ;;  %v1129_v20 = vld [vmem:[#allocation13 + $0x180] sm:$0xff] }
  0xf9   :  { %935 = vmatpush.msra.mxu2 %v639_v24  ;;  %975 = vmatpush.msrb.mxu0 %v512_v25  ;;  %v724_v18 = vld [vmem:[#allocation10 + $0x7d8] sm:$0xff]  ;;  %v1197_v24 = vld [vmem:[#allocation13 + $0x3a0] sm:$0xff] }
  0xfa   :  { %952 = vmatpush.msra.mxu3 %v715_v26  ;;  %992 = vmatpush.msrb.mxu1 %v588_v27  ;;  %v644_v22 = vld [vmem:[#allocation10 + $0x558] sm:$0xff]  ;;  %v1125_v25 = vld [vmem:[#allocation13 + $0x160] sm:$0xff] }
  0xfb   :  { %885 = vmatmul.f32.vlgmr.msrb.gmra.mxu3 %v1802_v15  ;;  %936 = vmatpush.msra.mxu2 %v635_v28  ;;  %v720_v23 = vld [vmem:[#allocation10 + $0x7b8] sm:$0xff]  ;;  %v1121_v28 = vld [vmem:[#allocation13 + $0x140] sm:$0xff] }
  0xfc   :  { %953 = vmatpush.msra.mxu3 %v711_v29  ;;  %976 = vmatpush.msrb.mxu0 %v508_v30  ;;  %v640_v26 = vld [vmem:[#allocation10 + $0x538] sm:$0xff] }
  0xfd   :  { %993 = vmatpush.msrb.mxu1 %v584_v31  ;;  %937 = vmatpush.msra.mxu2 %v631_v32  ;;  %v716_v27 = vld [vmem:[#allocation10 + $0x798] sm:$0xff]  ;;  %v1189_v31 = vld [vmem:[#allocation13 + $0x360] sm:$0xff] }
  0xfe   :  { %954 = vmatpush.msra.mxu3 %v707_v33  ;;  %977 = vmatpush.msrb.mxu0 %v504_v34  ;;  %v636_v29 = vld [vmem:[#allocation10 + $0x518] sm:$0xff]  ;;  %v1117_v32 = vld [vmem:[#allocation13 + $0x120] sm:$0xff] }
  0xff   :  { %994 = vmatpush.msrb.mxu1 %v580_v35  ;;  %938 = vmatpush.msra.mxu2 %v627_v36  ;;  %v712_v30 = vld [vmem:[#allocation10 + $0x778] sm:$0xff]  ;;  %v1185_v35 = vld [vmem:[#allocation13 + $0x340] sm:$0xff] }
 0x100   :  { %955 = vmatpush.msra.mxu3 %v703_v37  ;;  %978 = vmatpush.msrb.mxu0 %v500_v38  ;;  %v632_v33 = vld [vmem:[#allocation10 + $0x4f8] sm:$0xff]  ;;  %v1113_v36 = vld [vmem:[#allocation13 + $0x100] sm:$0xff] }
 0x101   :  { %995 = vmatpush.msrb.mxu1 %v576_v39  ;;  %939 = vmatpush.msra.mxu2 %v623_v40  ;;  %v708_v34 = vld [vmem:[#allocation10 + $0x758] sm:$0xff]  ;;  %v1181_v39 = vld [vmem:[#allocation13 + $0x320] sm:$0xff] }
 0x102   :  { %956 = vmatpush.msra.mxu3 %v699_v41  ;;  %979 = vmatpush.msrb.mxu0 %v496_v42  ;;  %v628_v37 = vld [vmem:[#allocation10 + $0x4d8] sm:$0xff]  ;;  %v1109_v40 = vld [vmem:[#allocation13 + $0xe0] sm:$0xff] }
 0x103   :  { %996 = vmatpush.msrb.mxu1 %v572_v43  ;;  %940 = vmatpush.msra.mxu2 %v619_v44  ;;  %v704_v38 = vld [vmem:[#allocation10 + $0x738] sm:$0xff]  ;;  %v1177_v43 = vld [vmem:[#allocation13 + $0x300] sm:$0xff] }
 0x104   :  { %957 = vmatpush.msra.mxu3 %v695_v45  ;;  %980 = vmatpush.msrb.mxu0 %v492_v46  ;;  %v624_v41 = vld [vmem:[#allocation10 + $0x4b8] sm:$0xff]  ;;  %v1105_v44 = vld [vmem:[#allocation13 + $0xc0] sm:$0xff] }
 0x105   :  { %997 = vmatpush.msrb.mxu1 %v568_v47  ;;  %941 = vmatpush.msra.mxu2 %v615_v48  ;;  %v700_v42 = vld [vmem:[#allocation10 + $0x718] sm:$0xff]  ;;  %v1173_v47 = vld [vmem:[#allocation13 + $0x2e0] sm:$0xff] }
 0x106   :  { %958 = vmatpush.msra.mxu3 %v691_v50  ;;  %981 = vmatpush.msrb.mxu0 %v488_v51  ;;  %v620_v45 = vld [vmem:[#allocation10 + $0x498] sm:$0xff]  ;;  %v1101_v48 = vld [vmem:[#allocation13 + $0xa0] sm:$0xff] }
 0x107   :  { %998 = vmatpush.msrb.mxu1 %v564_v53  ;;  %942 = vmatpush.msra.mxu2 %v611_v54  ;;  %v696_v46 = vld [vmem:[#allocation10 + $0x6f8] sm:$0xff]  ;;  %v1169_v53 = vld [vmem:[#allocation13 + $0x2c0] sm:$0xff] }
 0x108   :  { %959 = vmatpush.msra.mxu3 %v687_v55  ;;  %982 = vmatpush.msrb.mxu0 %v484_v56  ;;  %v616_v50 = vld [vmem:[#allocation10 + $0x478] sm:$0xff]  ;;  %v1097_v54 = vld [vmem:[#allocation13 + $0x80] sm:$0xff] }
 0x109   :  { %999 = vmatpush.msrb.mxu1 %v560_v57  ;;  %943 = vmatpush.msra.mxu2 %v607_v58  ;;  %v692_v51 = vld [vmem:[#allocation10 + $0x6d8] sm:$0xff]  ;;  %v1165_v57 = vld [vmem:[#allocation13 + $0x2a0] sm:$0xff] }
 0x10a   :  { %960 = vmatpush.msra.mxu3 %v683_v59  ;;  %983 = vmatpush.msrb.mxu0 %v480_v60  ;;  %v612_v55 = vld [vmem:[#allocation10 + $0x458] sm:$0xff]  ;;  %v1093_v58 = vld [vmem:[#allocation13 + $0x60] sm:$0xff] }
 0x10b   :  { %1000 = vmatpush.msrb.mxu1 %v556_v62  ;;  %944 = vmatpush.msra.mxu2 %v603_v63  ;;  %v688_v56 = vld [vmem:[#allocation10 + $0x6b8] sm:$0xff]  ;;  %v1161_v62 = vld [vmem:[#allocation13 + $0x280] sm:$0xff] }
 0x10c   :  { %961 = vmatpush.msra.mxu3 %v679_v2  ;;  %984 = vmatpush.msrb.mxu0 %v476_v3  ;;  %v608_v59 = vld [vmem:[#allocation10 + $0x438] sm:$0xff]  ;;  %v1089_v63 = vld [vmem:[#allocation13 + $0x40] sm:$0xff] }
 0x10d   :  { %1001 = vmatpush.msrb.mxu1 %v552_v4  ;;  %945 = vmatmul.f32.vlgmr.msra.gmra.mxu2 %v1797_v61  ;;  %v684_v60 = vld [vmem:[#allocation10 + $0x698] sm:$0xff]  ;;  %v1157_v4 = vld [vmem:[#allocation13 + $0x260] sm:$0xff] }
 0x10e   :  { %985 = vmatmul.f32.vlgmr.msrb.gmra.mxu0 %v1785_v7  ;;  %1009 = vmatpush.msrb.mxu2 %v664_v5  ;;  %v1205_v7 = vld [vmem:[#allocation13 + $0x3e0] sm:$0xff]  ;;  %v604_v2 = vld [vmem:[#allocation10 + $0x418] sm:$0xff] }
 0x10f   :  { %962 = vmatpush.msra.mxu3 %v675_v6  ;;  %1002 = vmatpush.msrb.mxu1 %v548_v49  ;;  %v680_v3 = vld [vmem:[#allocation10 + $0x678] sm:$0xff]  ;;  %v1085_v6 = vld [vmem:[#allocation13 + $0x20] sm:$0xff] }
 0x110   :  { %1010 = vmatpush.msrb.mxu2 %v660_v8  ;;  %1209 = vmatpush.msra.mxu0 %v1141_v9  ;;  %v676_v5 = vld [vmem:[#allocation10 + $0x658] sm:$0xff]  ;;  %v1153_v49 = vld [vmem:[#allocation13 + $0x240] sm:$0xff]  ;;  %v1142_v8 = vld [vmem:[#allocation13 + $0x1e8] sm:$0xff] }
 0x111   :  { %963 = vmatpush.msra.mxu3 %v671_v10  ;;  %1003 = vmatpush.msrb.mxu1 %v544_v11  ;;  %v672_v9 = vld [vmem:[#allocation10 + $0x638] sm:$0xff]  ;;  %v1081_v10 = vld [vmem:[#allocation13] sm:$0xff] }
 0x112   :  { %1011 = vmatpush.msrb.mxu2 %v656_v12  ;;  %1210 = vmatpush.msra.mxu0 %v1137_v13  ;;  %v1149_v11 = vld [vmem:[#allocation13 + $0x220] sm:$0xff]  ;;  %v668_v12 = vld [vmem:[#allocation10 + $0x618] sm:$0xff] }
 0x113   :  { %964 = vmatpush.msra.mxu3 %v667_v14  ;;  %1004 = vmatpush.msrb.mxu1 %v540_v52  ;;  %v1143_v13 = vld [vmem:[#allocation13 + $0x1f0] sm:$0xff]  ;;  %v1145_v14 = vld [vmem:[#allocation13 + $0x200] sm:$0xff] }
 0x114   :  { %965 = vmatmul.f32.vlgmr.msra.gmra.mxu3 %v1802_v15  ;;  %1005 = vmatmul.f32.vlgmr.msrb.gmra.mxu1 %v1789_v21  ;;  %v1193_v21 = vld [vmem:[#allocation13 + $0x380] sm:$0xff] }
 0x115   :  { %1012 = vmatpush.msrb.mxu2 %v652_v0  ;;  %1029 = vmatpush.msrb.mxu3 %v728_v16  ;;  %v1813_v52 = vld [vmem:[#allocation2] sm:$0xff] }
 0x116   :  { %1229 = vmatpush.msra.mxu1 %v1205_v7  ;;  %1211 = vmatpush.msra.mxu0 %v1133_v1  ;;  %v1206_v0 = vld [vmem:[#allocation13 + $0x3e8] sm:$0xff]  ;;  %v1139_v1 = vld [vmem:[#allocation13 + $0x1d0] sm:$0xff] }
 0x117   :  { %1013 = vmatpush.msrb.mxu2 %v648_v17  ;;  %1030 = vmatpush.msrb.mxu3 %v724_v18  ;;  %v1138_v16 = vld [vmem:[#allocation13 + $0x1c8] sm:$0xff]  ;;  %v1203_v18 = vld [vmem:[#allocation13 + $0x3d0] sm:$0xff] }
 0x118   :  { %1230 = vmatpush.msra.mxu1 %v1201_v19  ;;  %1212 = vmatpush.msra.mxu0 %v1129_v20  ;;  %v1202_v7 = vld [vmem:[#allocation13 + $0x3c8] sm:$0xff] }
 0x119   :  { %1014 = vmatpush.msrb.mxu2 %v644_v22  ;;  %1031 = vmatpush.msrb.mxu3 %v720_v23  ;;  %v1817_v17 = vld [vmem:[#allocation2 + $0x8] sm:$0xff] }
 0x11a   :  { %1231 = vmatpush.msra.mxu1 %v1197_v24  ;;  %1213 = vmatpush.msra.mxu0 %v1125_v25  ;;  %v1134_v19 = vld [vmem:[#allocation13 + $0x1a8] sm:$0xff]  ;;  %v1135_v22 = vld [vmem:[#allocation13 + $0x1b0] sm:$0xff] }
 0x11b   :  { %1015 = vmatpush.msrb.mxu2 %v640_v26  ;;  %1032 = vmatpush.msrb.mxu3 %v716_v27  ;;  %v1198_v20 = vld [vmem:[#allocation13 + $0x3a8] sm:$0xff]  ;;  %v1199_v23 = vld [vmem:[#allocation13 + $0x3b0] sm:$0xff] }
 0x11c   :  { %1232 = vmatpush.msra.mxu1 %v1193_v21  ;;  %1214 = vmatpush.msra.mxu0 %v1121_v28  ;;  %v1130_v24 = vld [vmem:[#allocation13 + $0x188] sm:$0xff]  ;;  %v1131_v25 = vld [vmem:[#allocation13 + $0x190] sm:$0xff] }
 0x11d   :  { %1016 = vmatpush.msrb.mxu2 %v636_v29  ;;  %1033 = vmatpush.msrb.mxu3 %v712_v30  ;;  %v1195_v26 = vld [vmem:[#allocation13 + $0x390] sm:$0xff]  ;;  %v1126_v27 = vld [vmem:[#allocation13 + $0x168] sm:$0xff] }
 0x11e   :  { %1233 = vmatpush.msra.mxu1 %v1189_v31  ;;  %1215 = vmatpush.msra.mxu0 %v1117_v32  ;;  %v1190_v21 = vld [vmem:[#allocation13 + $0x368] sm:$0xff]  ;;  %v1127_v28 = vld [vmem:[#allocation13 + $0x170] sm:$0xff] }
 0x11f   :  { %1017 = vmatpush.msrb.mxu2 %v632_v33  ;;  %1034 = vmatpush.msrb.mxu3 %v708_v34  ;;  %v1191_v29 = vld [vmem:[#allocation13 + $0x370] sm:$0xff]  ;;  %v1122_v30 = vld [vmem:[#allocation13 + $0x148] sm:$0xff] }
 0x120   :  { %1234 = vmatpush.msra.mxu1 %v1185_v35  ;;  %1216 = vmatpush.msra.mxu0 %v1113_v36  ;;  %v1186_v31 = vld [vmem:[#allocation13 + $0x348] sm:$0xff]  ;;  %v1123_v32 = vld [vmem:[#allocation13 + $0x150] sm:$0xff] }
 0x121   :  { %1018 = vmatpush.msrb.mxu2 %v628_v37  ;;  %1035 = vmatpush.msrb.mxu3 %v704_v38  ;;  %v1187_v33 = vld [vmem:[#allocation13 + $0x350] sm:$0xff]  ;;  %v1118_v34 = vld [vmem:[#allocation13 + $0x128] sm:$0xff] }
 0x122   :  { %1235 = vmatpush.msra.mxu1 %v1181_v39  ;;  %1217 = vmatpush.msra.mxu0 %v1109_v40  ;;  %v1182_v35 = vld [vmem:[#allocation13 + $0x328] sm:$0xff]  ;;  %v1119_v36 = vld [vmem:[#allocation13 + $0x130] sm:$0xff] }
 0x123   :  { %1019 = vmatpush.msrb.mxu2 %v624_v41  ;;  %1036 = vmatpush.msrb.mxu3 %v700_v42  ;;  %v1183_v37 = vld [vmem:[#allocation13 + $0x330] sm:$0xff]  ;;  %v1114_v38 = vld [vmem:[#allocation13 + $0x108] sm:$0xff] }
 0x124   :  { %1236 = vmatpush.msra.mxu1 %v1177_v43  ;;  %1218 = vmatpush.msra.mxu0 %v1105_v44  ;;  %v1178_v39 = vld [vmem:[#allocation13 + $0x308] sm:$0xff]  ;;  %v1115_v40 = vld [vmem:[#allocation13 + $0x110] sm:$0xff] }
 0x125   :  { %1020 = vmatpush.msrb.mxu2 %v620_v45  ;;  %1037 = vmatpush.msrb.mxu3 %v696_v46  ;;  %v1179_v41 = vld [vmem:[#allocation13 + $0x310] sm:$0xff]  ;;  %v1110_v42 = vld [vmem:[#allocation13 + $0xe8] sm:$0xff] }
 0x126   :  { %1237 = vmatpush.msra.mxu1 %v1173_v47  ;;  %1219 = vmatpush.msra.mxu0 %v1101_v48  ;;  %v1174_v43 = vld [vmem:[#allocation13 + $0x2e8] sm:$0xff]  ;;  %v1111_v44 = vld [vmem:[#allocation13 + $0xf0] sm:$0xff] }
 0x127   :  { %1021 = vmatpush.msrb.mxu2 %v616_v50  ;;  %1038 = vmatpush.msrb.mxu3 %v692_v51  ;;  %v1175_v45 = vld [vmem:[#allocation13 + $0x2f0] sm:$0xff]  ;;  %v1106_v46 = vld [vmem:[#allocation13 + $0xc8] sm:$0xff] }
 0x128   :  { %1238 = vmatpush.msra.mxu1 %v1169_v53  ;;  %1220 = vmatpush.msra.mxu0 %v1097_v54  ;;  %v1170_v47 = vld [vmem:[#allocation13 + $0x2c8] sm:$0xff]  ;;  %v1107_v48 = vld [vmem:[#allocation13 + $0xd0] sm:$0xff] }
 0x129   :  { %1022 = vmatpush.msrb.mxu2 %v612_v55  ;;  %1039 = vmatpush.msrb.mxu3 %v688_v56  ;;  %v1171_v50 = vld [vmem:[#allocation13 + $0x2d0] sm:$0xff]  ;;  %v1102_v51 = vld [vmem:[#allocation13 + $0xa8] sm:$0xff] }
 0x12a   :  { %1239 = vmatpush.msra.mxu1 %v1165_v57  ;;  %1221 = vmatpush.msra.mxu0 %v1093_v58  ;;  %v1166_v53 = vld [vmem:[#allocation13 + $0x2a8] sm:$0xff]  ;;  %v1103_v54 = vld [vmem:[#allocation13 + $0xb0] sm:$0xff] }
 0x12b   :  { %1023 = vmatpush.msrb.mxu2 %v608_v59  ;;  %1040 = vmatpush.msrb.mxu3 %v684_v60  ;;  %v1167_v55 = vld [vmem:[#allocation13 + $0x2b0] sm:$0xff]  ;;  %v1098_v56 = vld [vmem:[#allocation13 + $0x88] sm:$0xff] }
 0x12c   :  { %1240 = vmatpush.msra.mxu1 %v1161_v62  ;;  %1222 = vmatpush.msra.mxu0 %v1089_v63  ;;  %v1162_v57 = vld [vmem:[#allocation13 + $0x288] sm:$0xff]  ;;  %v1099_v58 = vld [vmem:[#allocation13 + $0x90] sm:$0xff] }
 0x12d   :  { %1024 = vmatpush.msrb.mxu2 %v604_v2  ;;  %1041 = vmatpush.msrb.mxu3 %v680_v3  ;;  %v1163_v59 = vld [vmem:[#allocation13 + $0x290] sm:$0xff]  ;;  %v1094_v60 = vld [vmem:[#allocation13 + $0x68] sm:$0xff] }
 0x12e   :  { %1241 = vmatpush.msra.mxu1 %v1157_v4  ;;  %1025 = vmatmul.f32.vlgmr.msrb.gmra.mxu2 %v1797_v61  ;;  %v1207_v61 = vld [vmem:[#allocation13 + $0x3f0] sm:$0xff]  ;;  %v1158_v62 = vld [vmem:[#allocation13 + $0x268] sm:$0xff] }
 0x12f   :  { %1042 = vmatpush.msrb.mxu3 %v676_v5  ;;  %1223 = vmatpush.msra.mxu0 %v1085_v6  ;;  %v1095_v63 = vld [vmem:[#allocation13 + $0x70] sm:$0xff]  ;;  %v1090_v3 = vld [vmem:[#allocation13 + $0x48] sm:$0xff] }
 0x130   :  { %1242 = vmatpush.msra.mxu1 %v1153_v49  ;;  %1249 = vmatpush.msra.mxu2 %v1142_v8  ;;  %v1159_v2 = vld [vmem:[#allocation13 + $0x270] sm:$0xff]  ;;  %v1154_v4 = vld [vmem:[#allocation13 + $0x248] sm:$0xff] }
 0x131   :  { %1043 = vmatpush.msrb.mxu3 %v672_v9  ;;  %1224 = vmatpush.msra.mxu0 %v1081_v10  ;;  %v1091_v5 = vld [vmem:[#allocation13 + $0x50] sm:$0xff]  ;;  %v1086_v49 = vld [vmem:[#allocation13 + $0x28] sm:$0xff] }
 0x132   :  { %1243 = vmatpush.msra.mxu1 %v1149_v11  ;;  %1225 = vmatmul.f32.vlgmr.msra.gmra.mxu0 %v1813_v52  ;;  %v1155_v6 = vld [vmem:[#allocation13 + $0x250] sm:$0xff]  ;;  %v1150_v8 = vld [vmem:[#allocation13 + $0x228] sm:$0xff] }
 0x133   :  { %1044 = vmatpush.msrb.mxu3 %v668_v12  ;;  %1289 = vmatpush.msrb.mxu0 %v1143_v13  ;;  %v1087_v9 = vld [vmem:[#allocation13 + $0x30] sm:$0xff]  ;;  %v1082_v11 = vld [vmem:[#allocation13 + $0x8] sm:$0xff] }
 0x134   :  { %1244 = vmatpush.msra.mxu1 %v1145_v14  ;;  %1045 = vmatmul.f32.vlgmr.msrb.gmra.mxu3 %v1802_v15  ;;  %v1194_v15 = vld [vmem:[#allocation13 + $0x388] sm:$0xff]  ;;  %v1151_v10 = vld [vmem:[#allocation13 + $0x230] sm:$0xff] }
 0x135   :  { %1245 = vmatmul.f32.vlgmr.msra.gmra.mxu1 %v1817_v17  ;;  %1269 = vmatpush.msra.mxu3 %v1206_v0  ;;  %v1146_v12 = vld [vmem:[#allocation13 + $0x208] sm:$0xff]  ;;  %v1083_v13 = vld [vmem:[#allocation13 + $0x10] sm:$0xff]  ;;  %v1144_v0 = vld [vmem:[#allocation13 + $0x1f8] sm:$0xff] }
 0x136   :  { %1309 = vmatpush.msrb.mxu1 %v1207_v61  ;;  %1250 = vmatpush.msra.mxu2 %v1138_v16  ;;  %v1147_v14 = vld [vmem:[#allocation13 + $0x210] sm:$0xff]  ;;  %v1208_v61 = vld [vmem:[#allocation13 + $0x3f8] sm:$0xff] }
 0x137   :  { %1270 = vmatpush.msra.mxu3 %v1202_v7  ;;  %1290 = vmatpush.msrb.mxu0 %v1139_v1  ;;  %v1140_v16 = vld [vmem:[#allocation13 + $0x1d8] sm:$0xff] }
 0x138   :  { %1310 = vmatpush.msrb.mxu1 %v1203_v18  ;;  %1251 = vmatpush.msra.mxu2 %v1134_v19  ;;  %v1204_v7 = vld [vmem:[#allocation13 + $0x3d8] sm:$0xff] }
 0x139   :  { %1271 = vmatpush.msra.mxu3 %v1198_v20  ;;  %1291 = vmatpush.msrb.mxu0 %v1135_v22  ;;  %v1136_v1 = vld [vmem:[#allocation13 + $0x1b8] sm:$0xff] }
 0x13a   :  { %1311 = vmatpush.msrb.mxu1 %v1199_v23  ;;  %1252 = vmatpush.msra.mxu2 %v1130_v24  ;;  %v1200_v18 = vld [vmem:[#allocation13 + $0x3b8] sm:$0xff] }
 0x13b   :  { %1272 = vmatpush.msra.mxu3 %v1194_v15  ;;  %1292 = vmatpush.msrb.mxu0 %v1131_v25  ;;  %v1132_v19 = vld [vmem:[#allocation13 + $0x198] sm:$0xff] }
 0x13c   :  { %1312 = vmatpush.msrb.mxu1 %v1195_v26  ;;  %1253 = vmatpush.msra.mxu2 %v1126_v27  ;;  %v1196_v20 = vld [vmem:[#allocation13 + $0x398] sm:$0xff] }
 0x13d   :  { %1273 = vmatpush.msra.mxu3 %v1190_v21  ;;  %1293 = vmatpush.msrb.mxu0 %v1127_v28  ;;  %v1128_v22 = vld [vmem:[#allocation13 + $0x178] sm:$0xff] }
 0x13e   :  { %1313 = vmatpush.msrb.mxu1 %v1191_v29  ;;  %1254 = vmatpush.msra.mxu2 %v1122_v30  ;;  %v1192_v23 = vld [vmem:[#allocation13 + $0x378] sm:$0xff] }
 0x13f   :  { %1274 = vmatpush.msra.mxu3 %v1186_v31  ;;  %1294 = vmatpush.msrb.mxu0 %v1123_v32  ;;  %v1124_v24 = vld [vmem:[#allocation13 + $0x158] sm:$0xff] }
 0x140   :  { %1314 = vmatpush.msrb.mxu1 %v1187_v33  ;;  %1255 = vmatpush.msra.mxu2 %v1118_v34  ;;  %v1188_v15 = vld [vmem:[#allocation13 + $0x358] sm:$0xff] }
 0x141   :  { %1275 = vmatpush.msra.mxu3 %v1182_v35  ;;  %1295 = vmatpush.msrb.mxu0 %v1119_v36  ;;  %v1120_v25 = vld [vmem:[#allocation13 + $0x138] sm:$0xff] }
 0x142   :  { %1315 = vmatpush.msrb.mxu1 %v1183_v37  ;;  %1256 = vmatpush.msra.mxu2 %v1114_v38  ;;  %v1184_v26 = vld [vmem:[#allocation13 + $0x338] sm:$0xff] }
 0x143   :  { %1276 = vmatpush.msra.mxu3 %v1178_v39  ;;  %1296 = vmatpush.msrb.mxu0 %v1115_v40  ;;  %v1116_v27 = vld [vmem:[#allocation13 + $0x118] sm:$0xff] }
 0x144   :  { %1316 = vmatpush.msrb.mxu1 %v1179_v41  ;;  %1257 = vmatpush.msra.mxu2 %v1110_v42  ;;  %v1180_v21 = vld [vmem:[#allocation13 + $0x318] sm:$0xff] }
 0x145   :  { %1277 = vmatpush.msra.mxu3 %v1174_v43  ;;  %1297 = vmatpush.msrb.mxu0 %v1111_v44  ;;  %v1112_v28 = vld [vmem:[#allocation13 + $0xf8] sm:$0xff] }
 0x146   :  { %1317 = vmatpush.msrb.mxu1 %v1175_v45  ;;  %1258 = vmatpush.msra.mxu2 %v1106_v46  ;;  %v1176_v29 = vld [vmem:[#allocation13 + $0x2f8] sm:$0xff] }
 0x147   :  { %1278 = vmatpush.msra.mxu3 %v1170_v47  ;;  %1298 = vmatpush.msrb.mxu0 %v1107_v48  ;;  %v1108_v30 = vld [vmem:[#allocation13 + $0xd8] sm:$0xff]  ;;  %v746_v44 = vpop.f32.mrf.mxu0 }
 0x148   :  { %1318 = vmatpush.msrb.mxu1 %v1171_v50  ;;  %1259 = vmatpush.msra.mxu2 %v1102_v51  ;;  %v1172_v31 = vld [vmem:[#allocation13 + $0x2d8] sm:$0xff] }
 0x149   :  { %1279 = vmatpush.msra.mxu3 %v1166_v53  ;;  %1299 = vmatpush.msrb.mxu0 %v1103_v54  ;;  %v1104_v32 = vld [vmem:[#allocation13 + $0xb8] sm:$0xff] }
 0x14a   :  { %1319 = vmatpush.msrb.mxu1 %v1167_v55  ;;  %1260 = vmatpush.msra.mxu2 %v1098_v56  ;;  %v1168_v33 = vld [vmem:[#allocation13 + $0x2b8] sm:$0xff] }
 0x14b   :  { %1280 = vmatpush.msra.mxu3 %v1162_v57  ;;  %1300 = vmatpush.msrb.mxu0 %v1099_v58  ;;  %v1100_v34 = vld [vmem:[#allocation13 + $0x98] sm:$0xff]  ;;  %v1831_v58 = vld [vmem:[%s1867_s5] sm:$0xf]  ;;  %s1677_s5 = smov [#allocation16]  }
 0x14c   :  { %1320 = vmatpush.msrb.mxu1 %v1163_v59  ;;  %1261 = vmatpush.msra.mxu2 %v1094_v60  ;;  %v1164_v35 = vld [vmem:[#allocation13 + $0x298] sm:$0xff] }
 0x14d   :  { %1281 = vmatpush.msra.mxu3 %v1158_v62  ;;  %1301 = vmatpush.msrb.mxu0 %v1095_v63  ;;  %v1096_v36 = vld [vmem:[#allocation13 + $0x78] sm:$0xff]  ;;  %v1836_v62 = vld [vmem:[#allocation14] sm:$0xf] }
 0x14e   :  { %1321 = vmatpush.msrb.mxu1 %v1159_v2  ;;  %1262 = vmatpush.msra.mxu2 %v1090_v3  ;;  %v1160_v37 = vld [vmem:[#allocation13 + $0x278] sm:$0xff]  ;;  %v766_v45 = vpop.f32.mrf.mxu1 }
 0x14f   :  { %1282 = vmatpush.msra.mxu3 %v1154_v4  ;;  %1302 = vmatpush.msrb.mxu0 %v1091_v5  ;;  %v1092_v38 = vld [vmem:[#allocation13 + $0x58] sm:$0xff]  ;;  %v826_v46 = vpop.f32.mrf.mxu0  ;;  %v767_v56 = vadd.f32 %v766_v45, %v746_v44  ;;  %v1842_v4 = vld [vmem:[%s1871_s9] sm:$0xf]  ;;  %v1371_v5 = vperm.slane %v1836_v62, 0  ;;  %s1410_s9 = sshll.u32 %s1677_s5, 4  ;;  %s1411_s9 = int_to_ptr.vmem [resolvable:$true] %s1410_s9 }
 0x150   :  { %1322 = vmatpush.msrb.mxu1 %v1155_v6  ;;  %1263 = vmatpush.msra.mxu2 %v1086_v49  ;;  %v1156_v39 = vld [vmem:[#allocation13 + $0x258] sm:$0xff] }
 0x151   :  { %1283 = vmatpush.msra.mxu3 %v1150_v8  ;;  %1303 = vmatpush.msrb.mxu0 %v1087_v9  ;;  %v1088_v40 = vld [vmem:[#allocation13 + $0x38] sm:$0xff]  ;;  %v1385_v9 = vperm.slane %v1842_v4, 0 }
 0x152   :  { %1323 = vmatpush.msrb.mxu1 %v1151_v10  ;;  %1264 = vmatpush.msra.mxu2 %v1082_v11  ;;  %v1152_v41 = vld [vmem:[#allocation13 + $0x238] sm:$0xff] }
 0x153   :  { %1284 = vmatpush.msra.mxu3 %v1146_v12  ;;  %1304 = vmatpush.msrb.mxu0 %v1083_v13  ;;  %v1084_v42 = vld [vmem:[#allocation13 + $0x18] sm:$0xff] }
 0x154   :  { %1324 = vmatpush.msrb.mxu1 %v1147_v14  ;;  %1265 = vmatmul.f32.vlgmr.msra.gmra.mxu2 %v1813_v52  ;;  %v1148_v43 = vld [vmem:[#allocation13 + $0x218] sm:$0xff] }
 0x155   :  { %1285 = vmatmul.f32.vlgmr.msra.gmra.mxu3 %v1817_v17  ;;  %1305 = vmatmul.f32.vlgmr.msrb.gmra.mxu0 %v1813_v52  ;;  %v1834_v60 = vld [vmem:[#allocation11] sm:$0xf] }
 0x156   :  { %1325 = vmatmul.f32.vlgmr.msrb.gmra.mxu1 %v1817_v17  ;;  %1329 = vmatpush.msrb.mxu2 %v1144_v0  ;;  %v846_v47 = vpop.f32.mrf.mxu1  ;;  %v1065_v2 = vperm.slane %v1834_v60, 0 }
 0x157   :  { %1349 = vmatpush.msrb.mxu3 %v1208_v61 }
 0x158   :  { %1330 = vmatpush.msrb.mxu2 %v1140_v16 }
 0x159   :  { %1350 = vmatpush.msrb.mxu3 %v1204_v7 }
 0x15a   :  { %1331 = vmatpush.msrb.mxu2 %v1136_v1 }
 0x15b   :  { %1351 = vmatpush.msrb.mxu3 %v1200_v18 }
 0x15c   :  { %1332 = vmatpush.msrb.mxu2 %v1132_v19  ;;  %v1053_v19 = vperm.slane %v1831_v58, 2 }
 0x15d   :  { %1352 = vmatpush.msrb.mxu3 %v1196_v20  ;;  %v847_v20 = vadd.f32 %v846_v47, %v826_v46 }
 0x15e   :  { %1333 = vmatpush.msrb.mxu2 %v1128_v22 }
 0x15f   :  { %1353 = vmatpush.msrb.mxu3 %v1192_v23 }
 0x160   :  { %1334 = vmatpush.msrb.mxu2 %v1124_v24 }
 0x161   :  { %1354 = vmatpush.msrb.mxu3 %v1188_v15  ;;  %v1067_v15 = vperm.slane %v1834_v60, 2 }
 0x162   :  { %1335 = vmatpush.msrb.mxu2 %v1120_v25 }
 0x163   :  { %1355 = vmatpush.msrb.mxu3 %v1184_v26 }
 0x164   :  { %1336 = vmatpush.msrb.mxu2 %v1116_v27  ;;  %v1052_v27 = vperm.slane %v1831_v58, 1 }
 0x165   :  { %1356 = vmatpush.msrb.mxu3 %v1180_v21 }
 0x166   :  { %1337 = vmatpush.msrb.mxu2 %v1112_v28  ;;  %v1373_v28 = vperm.slane %v1836_v62, 2 }
 0x167   :  { %1357 = vmatpush.msrb.mxu3 %v1176_v29  ;;  %v906_v48 = vpop.f32.mrf.mxu0 }
 0x168   :  { %1338 = vmatpush.msrb.mxu2 %v1108_v30 }
 0x169   :  { %1358 = vmatpush.msrb.mxu3 %v1172_v31 }
 0x16a   :  { %1339 = vmatpush.msrb.mxu2 %v1104_v32  ;;  %v1387_v32 = vperm.slane %v1842_v4, 2 }
 0x16b   :  { %1359 = vmatpush.msrb.mxu3 %v1168_v33 }
 0x16c   :  { %1340 = vmatpush.msrb.mxu2 %v1100_v34  ;;  %v1066_v34 = vperm.slane %v1834_v60, 1 }
 0x16d   :  { %1360 = vmatpush.msrb.mxu3 %v1164_v35 }
 0x16e   :  { %1341 = vmatpush.msrb.mxu2 %v1096_v36  ;;  %v926_v50 = vpop.f32.mrf.mxu1 }
 0x16f   :  { %1361 = vmatpush.msrb.mxu3 %v1160_v37  ;;  %v786_v55 = vpop.f32.mrf.mxu2  ;;  %v927_v16 = vadd.f32 %v926_v50, %v906_v48  ;;  %v1372_v37 = vperm.slane %v1836_v62, 1 }
 0x170   :  { %1342 = vmatpush.msrb.mxu2 %v1092_v38  ;;  %v787_v59 = vadd.f32 %v786_v55, %v767_v56  ;;  %v1068_v56 = vperm.slane %v1834_v60, 3 }
 0x171   :  { %1362 = vmatpush.msrb.mxu3 %v1156_v39 }
 0x172   :  { %1343 = vmatpush.msrb.mxu2 %v1088_v40 }
 0x173   :  { %1363 = vmatpush.msrb.mxu3 %v1152_v41 }
 0x174   :  { %1344 = vmatpush.msrb.mxu2 %v1084_v42 }
 0x175   :  { %1364 = vmatpush.msrb.mxu3 %v1148_v43  ;;  %1345 = vmatmul.f32.vlgmr.msrb.gmra.mxu2 %v1813_v52  ;;  %v1386_v43 = vperm.slane %v1842_v4, 1 }
 0x176   :  { %1365 = vmatmul.f32.vlgmr.msrb.gmra.mxu3 %v1817_v17  ;;  %v806_v57 = vpop.f32.mrf.mxu3  ;;  %v1051_v17 = vperm.slane %v1831_v58, 0 }
 0x177   :  { %v807_v52 = vadd.f32 %v806_v57, %v787_v59  ;;  %v866_v14 = vpop.f32.mrf.mxu2  ;;  %v1374_v59 = vperm.slane %v1836_v62, 3 }
 0x178   :  { %v867_v22 = vadd.f32 %v866_v14, %v847_v20 }
 0x179   :  { %v1059_v63 = vmul.f32 %v1051_v17, %v807_v52 }
 0x17b   :  { %v1073_v49 = vadd.f32 %v1065_v2, %v1059_v63  ;;  %v1388_v2 = vperm.slane %v1842_v4, 3 }
 0x17d   :  { %v1077_v11 = vmax.f32 %v1073_v49, 0.0 }
 0x17e   :  { %v886_v0 = vpop.f32.mrf.mxu3 }
 0x17f   :  { %v887_v26 = vadd.f32 %v886_v0, %v867_v22 }
 0x181   :  { %v1060_v33 = vmul.f32 %v1052_v27, %v887_v26 }
 0x183   :  { %v1074_v41 = vadd.f32 %v1066_v34, %v1060_v33 }
 0x185   :  { %v1078_v46 = vmax.f32 %v1074_v41, 0.0 }
 0x18b   :  { %v986_v51 = vpop.f32.mrf.mxu0 }
 0x190   :  { %v946_v61 = vpop.f32.mrf.mxu2 }
 0x191   :  { %v1006_v53 = vpop.f32.mrf.mxu1  ;;  %v947_v1 = vadd.f32 %v946_v61, %v927_v16 }
 0x192   :  { %v1826_v54 = vadd.f32 %v1006_v53, %v986_v51  ;;  %v1054_v53 = vperm.slane %v1831_v58, 3 }
 0x197   :  { %v966_v7 = vpop.f32.mrf.mxu3 }
 0x198   :  { %v967_v18 = vadd.f32 %v966_v7, %v947_v1 }
 0x19a   :  { %v1061_v24 = vmul.f32 %v1053_v19, %v967_v18 }
 0x19c   :  { %v1075_v30 = vadd.f32 %v1067_v15, %v1061_v24 }
 0x19e   :  { %v1079_v38 = vmax.f32 %v1075_v30, 0.0 }
 0x1af   :  { %v1226_v3 = vpop.f32.mrf.mxu0 }
 0x1b1   :  { %v1026_v23 = vpop.f32.mrf.mxu2 }
 0x1b2   :  { %v1246_v6 = vpop.f32.mrf.mxu1  ;;  %v1027_v50 = vadd.f32 %v1026_v23, %v1826_v54 }
 0x1b3   :  { %v1247_v8 = vadd.f32 %v1246_v6, %v1226_v3 }
 0x1b5   :  { %v1379_v10 = vmul.f32 %v1371_v5, %v1247_v8 }
 0x1b7   :  { %v1393_v12 = vadd.f32 %v1385_v9, %v1379_v10  ;;  %v1046_v25 = vpop.f32.mrf.mxu3 }
 0x1b8   :  { %v1047_v51 = vadd.f32 %v1046_v25, %v1027_v50 }
 0x1b9   :  { %v1397_v13 = vadd.f32 %v1393_v12, %v1077_v11 }
 0x1ba   :  { %v1062_v55 = vmul.f32 %v1054_v53, %v1047_v51 }
 0x1bb   :  { %1401 = vst [vmem:[#allocation16] sm:$0xff] %v1397_v13 }
 0x1bc   :  { %v1076_v17 = vadd.f32 %v1068_v56, %v1062_v55 }
 0x1be   :  { %v1080_v54 = vmax.f32 %v1076_v17, 0.0 }
 0x1d2   :  { %v1306_v21 = vpop.f32.mrf.mxu0 }
 0x1d3   :  { %v1326_v29 = vpop.f32.mrf.mxu1 }
 0x1d4   :  { %v1327_v31 = vadd.f32 %v1326_v29, %v1306_v21 }
 0x1d6   :  { %v1381_v35 = vmul.f32 %v1373_v28, %v1327_v31 }
 0x1d7   :  { %v1266_v36 = vpop.f32.mrf.mxu2 }
 0x1d8   :  { %v1395_v39 = vadd.f32 %v1387_v32, %v1381_v35  ;;  %v1286_v40 = vpop.f32.mrf.mxu3 }
 0x1d9   :  { %v1287_v42 = vadd.f32 %v1286_v40, %v1266_v36 }
 0x1da   :  { %v1399_v44 = vadd.f32 %v1395_v39, %v1079_v38 }
 0x1db   :  { %v1380_v45 = vmul.f32 %v1372_v37, %v1287_v42 }
 0x1dc   :  { %1403 = vst [vmem:[#allocation16 + $0x10] sm:$0xff] %v1399_v44 }
 0x1dd   :  { %v1394_v47 = vadd.f32 %v1386_v43, %v1380_v45 }
 0x1df   :  { %v1398_v48 = vadd.f32 %v1394_v47, %v1078_v46 }
 0x1e1   :  { %1402 = vst [vmem:[#allocation16 + $0x8] sm:$0xff] %v1398_v48 }
 0x1f8   :  { %v1346_v57 = vpop.f32.mrf.mxu2 }
 0x1f9   :  { %v1366_v52 = vpop.f32.mrf.mxu3 }
 0x1fa   :  { %v1367_v63 = vadd.f32 %v1366_v52, %v1346_v57 }
 0x1fc   :  { %v1382_v3 = vmul.f32 %v1374_v59, %v1367_v63 }
 0x1fe   :  { %v1396_v58 = vadd.f32 %v1388_v2, %v1382_v3 }
 0x200   :  { %v1400_v5 = vadd.f32 %v1396_v58, %v1080_v54 }
 0x202   :  { %1404 = vst [vmem:[#allocation16 + $0x18] sm:$0xff] %v1400_v5 }
 0x203   :  { %1415 = dma.vmem_to_hbm [thread:$0]  %s1411_s9, 512, %s1413_s11, [#allocation4]  }
 0x204   :  { %1665 = dma.done.wait [#allocation4], 512  }
 0x205   :  { %1666 = vsyncadd [#allocation4], 4294966784 }
 0x206   :  { %1420 = vsyncpa [#allocation3], 1 }
 0x207   :  { %1421 = vsyncpa [#allocation6], 1 }
 0x208   :  { %1422 = vsyncpa [#allocation9], 1 }
 0x209   :  { %1423 = vsyncpa [#allocation12], 1 }
 0x20a   :  { %1424 = vsyncpa [#allocation15], 1 }
 0x20b   :  { %1425 = vsyncpa [#allocation4], 1 }

</bundles_post_ra>
